<compile_context>
chip_gen: v7x
topology: tpu7x:2x2x1
jax: 0.10.0
libtpu: 0.0.40
codegen_flags: <defaults>
</compile_context>

<pallas_src>
import functools

import jax
import jax.numpy as jnp
from jax.experimental import pallas as pl
from jax.experimental.pallas import tpu as pltpu

HIDDEN = 512


def _round_up(n, m):
    return ((n + m - 1) // m) * m


# ---------------------------------------------------------------------------
# Kernel body: one batch tile (tm rows), all weights resident in VMEM.
# ---------------------------------------------------------------------------
def _dqn_kernel(x_ref,
                w1_ref, b1_ref,
                wv2_ref, bv2_ref,
                wa2_ref, ba2_ref,
                w3_ref, b3_ref,
                out_ref):
    # Layer 1, fused value||advantage: (tm, obs) @ (obs, 1024) -> (tm, 1024)
    xb = x_ref[...].astype(jnp.bfloat16)
    h1 = jnp.dot(xb, w1_ref[...], preferred_element_type=jnp.float32) + b1_ref[...]
    h1 = jnp.maximum(h1, 0.0)

    hv = h1[:, :HIDDEN].astype(jnp.bfloat16)   # lane-aligned slice (512 = 4*128)
    ha = h1[:, HIDDEN:].astype(jnp.bfloat16)

    # Layer 2: branches have different inputs, so keep two (512,512) matmuls
    # (a block-diagonal fusion would double the HBM weight bytes).
    hv2 = jnp.maximum(
        jnp.dot(hv, wv2_ref[...], preferred_element_type=jnp.float32) + bv2_ref[...],
        0.0)
    ha2 = jnp.maximum(
        jnp.dot(ha, wa2_ref[...], preferred_element_type=jnp.float32) + ba2_ref[...],
        0.0)

    # Fused dueling head: W3/b3 were pre-folded on the host so that
    #   [hv2, ha2] @ W3 + b3  ==  val + (adv - adv.mean(axis=1, keepdims=True))
    h2 = jnp.concatenate([hv2, ha2], axis=1).astype(jnp.bfloat16)  # (tm, 1024)
    out_ref[...] = (
        jnp.dot(h2, w3_ref[...], preferred_element_type=jnp.float32) + b3_ref[...]
    )


# ---------------------------------------------------------------------------
# Host-side parameter fusion / quantization.
# ---------------------------------------------------------------------------
def prepare_params(params, dtype=jnp.bfloat16):
    """Fuse layer-1 weights and fold the dueling combine into the head.

    out = val + adv - mean(adv)
        = hv2 @ wv3 + bv3                               (broadcast over actions)
        + ha2 @ (wa3 - mean_cols(wa3)) + (ba3 - mean(ba3))
    which is a single linear map on [hv2, ha2].
    """
    actions_n = params["wa3"].shape[1]

    w1 = jnp.concatenate([params["wv1"], params["wa1"]], axis=1)   # (obs, 1024)
    b1 = jnp.concatenate([params["bv1"], params["ba1"]], axis=1)   # (1, 1024)

    wv3_b = jnp.tile(params["wv3"], (1, actions_n))                       # (512, A)
    wa3_c = params["wa3"] - params["wa3"].mean(axis=1, keepdims=True)     # (512, A)
    w3 = jnp.concatenate([wv3_b, wa3_c], axis=0)                          # (1024, A)
    b3 = params["bv3"] + params["ba3"] - params["ba3"].mean(axis=1, keepdims=True)

    return {
        "w1": w1.astype(dtype), "b1": b1.astype(jnp.float32),
        "wv2": params["wv2"].astype(dtype), "bv2": params["bv2"].astype(jnp.float32),
        "wa2": params["wa2"].astype(dtype), "ba2": params["ba2"].astype(jnp.float32),
        "w3": w3.astype(dtype), "b3": b3.astype(jnp.float32),
    }


# ---------------------------------------------------------------------------
# pallas_call wrapper: pad batch, tile it, keep weights resident.
# ---------------------------------------------------------------------------
@functools.partial(jax.jit, static_argnames=("block_m",))
def simple_ffdqn_forward(x, fused_params, block_m=256):
    """x: (batch, obs_len) f32 -> (batch, actions_n) f32."""
    batch, obs_len = x.shape
    actions_n = fused_params["w3"].shape[1]

    # Batch tile: multiple of the f32 sublane (8), capped at 256 (fills the
    # v6e 2x256^2 MXU; also a multiple of 128 for v5e's 4x128^2 MXU).
    tm = min(block_m, _round_up(batch, 8))
    padded = _round_up(batch, tm)
    if padded != batch:
        x = jnp.pad(x, ((0, padded - batch), (0, 0)))
    grid = (padded // tm,)

    # Constant index_map => weight blocks are identical every grid step, so
    # Pallas keeps them in VMEM (single HBM transfer per call).
    def _const(i):
        return (0, 0)

    def w_spec(a):
        return pl.BlockSpec(a.shape, _const)

    p = fused_params
    out = pl.pallas_call(
        _dqn_kernel,
        out_shape=jax.ShapeDtypeStruct((padded, actions_n), jnp.float32),
        grid=grid,
        in_specs=[
            pl.BlockSpec((tm, obs_len), lambda i: (i, 0)),   # x: tiled over batch
            w_spec(p["w1"]), w_spec(p["b1"]),
            w_spec(p["wv2"]), w_spec(p["bv2"]),
            w_spec(p["wa2"]), w_spec(p["ba2"]),
            w_spec(p["w3"]), w_spec(p["b3"]),
        ],
        out_specs=pl.BlockSpec((tm, actions_n), lambda i: (i, 0)),
        compiler_params=pltpu.CompilerParams(
            dimension_semantics=("parallel",)),   # batch tiles split across TCs (v7x)
    )(x, p["w1"], p["b1"], p["wv2"], p["bv2"], p["wa2"], p["ba2"], p["w3"], p["b3"])

    return out[:batch]


# ---------------------------------------------------------------------------
# Synthetic params + plain-JAX reference (original, un-fused math in f32).
# ---------------------------------------------------------------------------
def init_params(key, obs_len, actions_n, hidden=HIDDEN):
    keys = jax.random.split(key, 12)
    s = 0.05

    def w(k, shape):
        return jax.random.normal(k, shape, dtype=jnp.float32) * s

    return {
        "wv1": w(keys[0], (obs_len, hidden)), "bv1": w(keys[1], (1, hidden)),
        "wv2": w(keys[2], (hidden, hidden)),  "bv2": w(keys[3], (1, hidden)),
        "wv3": w(keys[4], (hidden, 1)),       "bv3": w(keys[5], (1, 1)),
        "wa1": w(keys[6], (obs_len, hidden)), "ba1": w(keys[7], (1, hidden)),
        "wa2": w(keys[8], (hidden, hidden)),  "ba2": w(keys[9], (1, hidden)),
        "wa3": w(keys[10], (hidden, actions_n)), "ba3": w(keys[11], (1, actions_n)),
    }


def _reference_forward(x, p):
    def mlp(x, w1, b1, w2, b2, w3, b3):
        h = jnp.maximum(x @ w1 + b1, 0.0)
        h = jnp.maximum(h @ w2 + b2, 0.0)
        return h @ w3 + b3

    val = mlp(x, p["wv1"], p["bv1"], p["wv2"], p["bv2"], p["wv3"], p["bv3"])
    adv = mlp(x, p["wa1"], p["ba1"], p["wa2"], p["ba2"], p["wa3"], p["ba3"])
    return val + (adv - adv.mean(axis=1, keepdims=True))


if __name__ == "__main__":
    obs_len = 32
    actions_n = 8

    key = jax.random.PRNGKey(0)
    key_x, key_x2, key_p = jax.random.split(key, 3)

    params = init_params(key_p, obs_len, actions_n)
    fused = prepare_params(params)            # bf16 weights, folded dueling head

    # Small case (batch=2 -> padded to one 8-row tile, grid=(1,)).
    x = jax.random.normal(key_x, (2, obs_len), dtype=jnp.float32)
    out = jax.block_until_ready(simple_ffdqn_forward(x, fused))
    ref = _reference_forward(x, params)
    assert out.shape == (2, actions_n)
    assert jnp.allclose(out, ref, atol=2e-2, rtol=2e-2), "small-batch mismatch"

    # Larger case exercising the batch grid (batch=272 -> 2 tiles of 256).
    x2 = jax.random.normal(key_x2, (272, obs_len), dtype=jnp.float32)
    out2 = jax.block_until_ready(simple_ffdqn_forward(x2, fused))
    ref2 = _reference_forward(x2, params)
    assert out2.shape == (272, actions_n)
    assert jnp.allclose(out2, ref2, atol=2e-2, rtol=2e-2), "batched mismatch"

    print("KERNEL_OK")
</pallas_src>

<mosaic_0001>
module attributes {stable_mosaic.version = 11 : i64} {
  func.func @_dqn_kernel(%arg0: i32, %arg1: memref<8x32xf32, #tpu.memory_space<vmem>>, %arg2: memref<32x1024xbf16, #tpu.memory_space<vmem>>, %arg3: memref<1x1024xf32, #tpu.memory_space<vmem>>, %arg4: memref<512x512xbf16, #tpu.memory_space<vmem>>, %arg5: memref<1x512xf32, #tpu.memory_space<vmem>>, %arg6: memref<512x512xbf16, #tpu.memory_space<vmem>>, %arg7: memref<1x512xf32, #tpu.memory_space<vmem>>, %arg8: memref<1024x8xbf16, #tpu.memory_space<vmem>>, %arg9: memref<1x8xf32, #tpu.memory_space<vmem>>, %arg10: memref<8x8xf32, #tpu.memory_space<vmem>>) attributes {dimension_semantics = [#tpu.dimension_semantics<parallel>], iteration_bounds = array<i64: 1>, scalar_prefetch = 0 : i64, scratch_operands = 0 : i64, tpu.core_type = #tpu.core_type<tc>, window_params = [{transform_indices = @transform_0, window_bounds = array<i64: 8, 32>}, {pipeline_mode = #tpu.pipeline_mode<synchronous>, transform_indices = @transform_1, window_bounds = array<i64: 32, 1024>}, {pipeline_mode = #tpu.pipeline_mode<synchronous>, transform_indices = @transform_2, window_bounds = array<i64: 1, 1024>}, {pipeline_mode = #tpu.pipeline_mode<synchronous>, transform_indices = @transform_3, window_bounds = array<i64: 512, 512>}, {pipeline_mode = #tpu.pipeline_mode<synchronous>, transform_indices = @transform_4, window_bounds = array<i64: 1, 512>}, {pipeline_mode = #tpu.pipeline_mode<synchronous>, transform_indices = @transform_5, window_bounds = array<i64: 512, 512>}, {pipeline_mode = #tpu.pipeline_mode<synchronous>, transform_indices = @transform_6, window_bounds = array<i64: 1, 512>}, {pipeline_mode = #tpu.pipeline_mode<synchronous>, transform_indices = @transform_7, window_bounds = array<i64: 1024, 8>}, {pipeline_mode = #tpu.pipeline_mode<synchronous>, transform_indices = @transform_8, window_bounds = array<i64: 1, 8>}, {transform_indices = @transform_9, window_bounds = array<i64: 8, 8>}]} {
    %c0 = arith.constant 0 : index
    %c0_0 = arith.constant 0 : index
    %0 = vector.load %arg1[%c0, %c0_0] : memref<8x32xf32, #tpu.memory_space<vmem>>, vector<8x32xf32>
    %1 = arith.truncf %0 : vector<8x32xf32> to vector<8x32xbf16>
    %c0_1 = arith.constant 0 : index
    %c0_2 = arith.constant 0 : index
    %2 = vector.load %arg2[%c0_1, %c0_2] : memref<32x1024xbf16, #tpu.memory_space<vmem>>, vector<32x1024xbf16>
    %cst = arith.constant dense<0.000000e+00> : vector<8x1024xf32>
    %3 = tpu.matmul %1, %2, %cst {dimension_numbers = #tpu.dot_dimension_numbers<[1], [0], [0], [1], [0, 0, 1, 1], [], []>} : vector<8x32xbf16>, vector<32x1024xbf16>, vector<8x1024xf32> -> vector<8x1024xf32>
    %c0_3 = arith.constant 0 : index
    %c0_4 = arith.constant 0 : index
    %4 = vector.load %arg3[%c0_3, %c0_4] : memref<1x1024xf32, #tpu.memory_space<vmem>>, vector<1x1024xf32>
    %5 = vector.broadcast %4 : vector<1x1024xf32> to vector<8x1024xf32>
    %6 = arith.addf %3, %5 : vector<8x1024xf32>
    %cst_5 = arith.constant 0.000000e+00 : f32
    %7 = vector.broadcast %cst_5 : f32 to vector<8x1024xf32>
    %8 = arith.maximumf %6, %7 : vector<8x1024xf32>
    %9 = vector.extract_strided_slice %8 {offsets = [0, 0], sizes = [8, 512], strides = [1, 1]} : vector<8x1024xf32> to vector<8x512xf32>
    %10 = arith.truncf %9 : vector<8x512xf32> to vector<8x512xbf16>
    %11 = vector.extract_strided_slice %8 {offsets = [0, 512], sizes = [8, 512], strides = [1, 1]} : vector<8x1024xf32> to vector<8x512xf32>
    %12 = arith.truncf %11 : vector<8x512xf32> to vector<8x512xbf16>
    %c0_6 = arith.constant 0 : index
    %c0_7 = arith.constant 0 : index
    %13 = vector.load %arg4[%c0_6, %c0_7] : memref<512x512xbf16, #tpu.memory_space<vmem>>, vector<512x512xbf16>
    %cst_8 = arith.constant dense<0.000000e+00> : vector<8x512xf32>
    %14 = tpu.matmul %10, %13, %cst_8 {dimension_numbers = #tpu.dot_dimension_numbers<[1], [0], [0], [1], [0, 0, 1, 1], [], []>} : vector<8x512xbf16>, vector<512x512xbf16>, vector<8x512xf32> -> vector<8x512xf32>
    %c0_9 = arith.constant 0 : index
    %c0_10 = arith.constant 0 : index
    %15 = vector.load %arg5[%c0_9, %c0_10] : memref<1x512xf32, #tpu.memory_space<vmem>>, vector<1x512xf32>
    %16 = vector.broadcast %15 : vector<1x512xf32> to vector<8x512xf32>
    %17 = arith.addf %14, %16 : vector<8x512xf32>
    %cst_11 = arith.constant 0.000000e+00 : f32
    %18 = vector.broadcast %cst_11 : f32 to vector<8x512xf32>
    %19 = arith.maximumf %17, %18 : vector<8x512xf32>
    %c0_12 = arith.constant 0 : index
    %c0_13 = arith.constant 0 : index
    %20 = vector.load %arg6[%c0_12, %c0_13] : memref<512x512xbf16, #tpu.memory_space<vmem>>, vector<512x512xbf16>
    %cst_14 = arith.constant dense<0.000000e+00> : vector<8x512xf32>
    %21 = tpu.matmul %12, %20, %cst_14 {dimension_numbers = #tpu.dot_dimension_numbers<[1], [0], [0], [1], [0, 0, 1, 1], [], []>} : vector<8x512xbf16>, vector<512x512xbf16>, vector<8x512xf32> -> vector<8x512xf32>
    %c0_15 = arith.constant 0 : index
    %c0_16 = arith.constant 0 : index
    %22 = vector.load %arg7[%c0_15, %c0_16] : memref<1x512xf32, #tpu.memory_space<vmem>>, vector<1x512xf32>
    %23 = vector.broadcast %22 : vector<1x512xf32> to vector<8x512xf32>
    %24 = arith.addf %21, %23 : vector<8x512xf32>
    %cst_17 = arith.constant 0.000000e+00 : f32
    %25 = vector.broadcast %cst_17 : f32 to vector<8x512xf32>
    %26 = arith.maximumf %24, %25 : vector<8x512xf32>
    %27 = tpu.concatenate %19, %26 in 1 : vector<8x512xf32>, vector<8x512xf32> -> vector<8x1024xf32>
    %28 = arith.truncf %27 : vector<8x1024xf32> to vector<8x1024xbf16>
    %c0_18 = arith.constant 0 : index
    %c0_19 = arith.constant 0 : index
    %29 = vector.load %arg8[%c0_18, %c0_19] : memref<1024x8xbf16, #tpu.memory_space<vmem>>, vector<1024x8xbf16>
    %cst_20 = arith.constant dense<0.000000e+00> : vector<8x8xf32>
    %30 = tpu.matmul %28, %29, %cst_20 {dimension_numbers = #tpu.dot_dimension_numbers<[1], [0], [0], [1], [0, 0, 1, 1], [], []>} : vector<8x1024xbf16>, vector<1024x8xbf16>, vector<8x8xf32> -> vector<8x8xf32>
    %c0_21 = arith.constant 0 : index
    %c0_22 = arith.constant 0 : index
    %31 = vector.load %arg9[%c0_21, %c0_22] : memref<1x8xf32, #tpu.memory_space<vmem>>, vector<1x8xf32>
    %32 = vector.broadcast %31 : vector<1x8xf32> to vector<8x8xf32>
    %33 = arith.addf %30, %32 : vector<8x8xf32>
    %c0_23 = arith.constant 0 : index
    %c0_24 = arith.constant 0 : index
    %34 = vector.load %arg10[%c0_23, %c0_24] : memref<8x8xf32, #tpu.memory_space<vmem>>, vector<8x8xf32>
    tpu.vector_store %arg10[%c0_23, %c0_24], %33 {strides = array<i32>} : memref<8x8xf32, #tpu.memory_space<vmem>>, vector<8x8xf32>,
    return
  }
  func.func @transform_0(%arg0: i32) -> (i32, i32) {
    %c0_i32 = arith.constant 0 : i32
    %c0_i32_0 = arith.constant 0 : i32
    return %arg0, %c0_i32 : i32, i32
  }
  func.func @transform_1(%arg0: i32) -> (i32, i32) {
    %c0_i32 = arith.constant 0 : i32
    %c0_i32_0 = arith.constant 0 : i32
    %c0_i32_1 = arith.constant 0 : i32
    return %c0_i32, %c0_i32_0 : i32, i32
  }
  func.func @transform_2(%arg0: i32) -> (i32, i32) {
    %c0_i32 = arith.constant 0 : i32
    %c0_i32_0 = arith.constant 0 : i32
    %c0_i32_1 = arith.constant 0 : i32
    return %c0_i32, %c0_i32_0 : i32, i32
  }
  func.func @transform_3(%arg0: i32) -> (i32, i32) {
    %c0_i32 = arith.constant 0 : i32
    %c0_i32_0 = arith.constant 0 : i32
    %c0_i32_1 = arith.constant 0 : i32
    return %c0_i32, %c0_i32_0 : i32, i32
  }
  func.func @transform_4(%arg0: i32) -> (i32, i32) {
    %c0_i32 = arith.constant 0 : i32
    %c0_i32_0 = arith.constant 0 : i32
    %c0_i32_1 = arith.constant 0 : i32
    return %c0_i32, %c0_i32_0 : i32, i32
  }
  func.func @transform_5(%arg0: i32) -> (i32, i32) {
    %c0_i32 = arith.constant 0 : i32
    %c0_i32_0 = arith.constant 0 : i32
    %c0_i32_1 = arith.constant 0 : i32
    return %c0_i32, %c0_i32_0 : i32, i32
  }
  func.func @transform_6(%arg0: i32) -> (i32, i32) {
    %c0_i32 = arith.constant 0 : i32
    %c0_i32_0 = arith.constant 0 : i32
    %c0_i32_1 = arith.constant 0 : i32
    return %c0_i32, %c0_i32_0 : i32, i32
  }
  func.func @transform_7(%arg0: i32) -> (i32, i32) {
    %c0_i32 = arith.constant 0 : i32
    %c0_i32_0 = arith.constant 0 : i32
    %c0_i32_1 = arith.constant 0 : i32
    return %c0_i32, %c0_i32_0 : i32, i32
  }
  func.func @transform_8(%arg0: i32) -> (i32, i32) {
    %c0_i32 = arith.constant 0 : i32
    %c0_i32_0 = arith.constant 0 : i32
    %c0_i32_1 = arith.constant 0 : i32
    return %c0_i32, %c0_i32_0 : i32, i32
  }
  func.func @transform_9(%arg0: i32) -> (i32, i32) {
    %c0_i32 = arith.constant 0 : i32
    %c0_i32_0 = arith.constant 0 : i32
    return %arg0, %c0_i32 : i32, i32
  }
}

</mosaic_0001>

<bundles_post_ra>
// kernel: simple_ffdqn_forward.1
= control target key start
LH: loop header
LB: loop body
LE: loop exit
PB: predicated region body
PF: predicated region fallthrough
CT: control target
= control target key end

     0   :  { %14 = vsyncpa [#allocation3], 0  ;;  %s4346_s0 = inlined_call_operand.vmem [shape: f32[8,32], index: 0, kind: input, shape index: {}]   ;;  %s4347_s1 = inlined_call_operand.vmem [shape: bf16[32,1024], index: 1, kind: input, shape index: {}]   ;;  %s4348_s2 = inlined_call_operand.vmem [shape: f32[1,1024], index: 2, kind: input, shape index: {}]   ;;  %s4349_s3 = inlined_call_operand.hbm [shape: bf16[512,512], index: 3, kind: input, shape index: {}]   ;;  %s4350_s4 = inlined_call_operand.vmem [shape: f32[1,512], index: 4, kind: input, shape index: {}]   ;;  %s4351_s5 = inlined_call_operand.hbm [shape: bf16[512,512], index: 5, kind: input, shape index: {}]   ;;  %s4352_s6 = inlined_call_operand.vmem [shape: f32[1,512], index: 6, kind: input, shape index: {}]   ;;  %s4353_s7 = inlined_call_operand.vmem [shape: bf16[1024,8], index: 7, kind: input, shape index: {}]   ;;  %s4354_s8 = inlined_call_operand.vmem [shape: f32[1,8], index: 8, kind: input, shape index: {}]   ;;  %s4355_s9 = inlined_call_operand.vmem [shape: f32[8,8], index: 9, kind: output, shape index: {}]  }
   0x1   :  { %15 = vsyncpa [#allocation5], 0  ;;  %s3950_s30 = smov [#allocation2]   ;;  %s3902_s13 = scalar_lea.hbm %s4349_s3, 16384 }
   0x2   :  { %s27_s10 = sshll.u32 %s3950_s30, 4  ;;  %p3903_p0 = scmp.ne.s32.totalorder %s4349_s3, %s3902_s13  ;;  %s28_s10 = int_to_ptr.vmem [resolvable:$true] %s27_s10 }
   0x3   :  { %p3906_p1 = scmp.lt.u32.totalorder %s3902_s13, %s4349_s3 }
   0x5   :  { %p3908_p2 = pnand %p3906_p1, %p3903_p0 }
   0x7   :  { %3911 = shalt.err (!%p3908_p2)
}
   0x8   :  { %s3912_s18 = scalar_lea.vmem %s28_s10, 16384  ;;  %p3917_p4 = scmp.lt.s32.totalorder %s28_s10, %s28_s10 }
   0x9   :  { %p3913_p3 = scmp.ne.s32.totalorder %s28_s10, %s3912_s18  ;;  %p3918_p5 = scmp.lt.s32.totalorder %s3912_s18, %s3912_s18 }
   0xb   :  { %p3919_p6 = por %p3918_p5, %p3917_p4 }
   0xd   :  { %p3920_p7 = pnand %p3919_p6, %p3913_p3 }
   0xf   :  { %3923 = shalt.err (!%p3920_p7)
}
  0x10   :  { %s3951_s19 = smov 256   ;;  %s3952_s20 = smov 16  }
  0x11   :  { %33 = dma.hbm_to_vmem [thread:$0]  %s4349_s3, 16384, %s28_s10, [#allocation3], %s3951_s19, %s3951_s19, %s3952_s20  }
  0x12   :  { %s3953_s23 = smov [#allocation4]   ;;  %s3924_s27 = scalar_lea.hbm %s4351_s5, 16384 }
  0x13   :  { %s41_s24 = sshll.u32 %s3953_s23, 4  ;;  %p3925_p8 = scmp.ne.s32.totalorder %s4351_s5, %s3924_s27  ;;  %s42_s24 = int_to_ptr.vmem [resolvable:$true] %s41_s24 }
  0x14   :  { %p3928_p9 = scmp.lt.u32.totalorder %s3924_s27, %s4351_s5 }
  0x16   :  { %p3930_p10 = pnand %p3928_p9, %p3925_p8 }
  0x18   :  { %3933 = shalt.err (!%p3930_p10)
}
  0x19   :  { %s3934_s12 = scalar_lea.vmem %s42_s24, 16384  ;;  %p3939_p12 = scmp.lt.s32.totalorder %s42_s24, %s42_s24 }
  0x1a   :  { %p3935_p11 = scmp.ne.s32.totalorder %s42_s24, %s3934_s12  ;;  %p3940_p13 = scmp.lt.s32.totalorder %s3934_s12, %s3934_s12 }
  0x1c   :  { %p3941_p0 = por %p3940_p13, %p3939_p12 }
  0x1e   :  { %p3942_p1 = pnand %p3941_p0, %p3935_p11 }
  0x20   :  { %3945 = shalt.err (!%p3942_p1)
}
  0x21   :  { %47 = dma.hbm_to_vmem [thread:$0]  %s4351_s5, 16384, %s42_s24, [#allocation5], %s3951_s19, %s3951_s19, %s3952_s20  }
  0x22   :  { %3946 = dma.done.wait [#allocation3], 16384  }
  0x23   :  { %3947 = vsyncadd [#allocation3], 4294950912 }
  0x24   :  { %3948 = dma.done.wait [#allocation5], 16384  }
  0x25   :  { %3949 = vsyncadd [#allocation5], 4294950912  ;;  %v3954_v0 = vmov 0   ;;  %v63_v1 = vld [vmem:[%s4347_s1] sm:$0xff]  ;;  %v64_v7 = vld [vmem:[%s4347_s1 + $0x8] sm:$0xff]  ;;  %vm201_vm0 = vcmask 261120  }
  0x26   :  { %237 = vmatprep.mubr.bf16.mxu0 %v3954_v0  ;;  %278 = vmatprep.mubr.bf16.mxu1 %v3954_v0  ;;  %v67_v2 = vld [vmem:[%s4347_s1 + $0x20] sm:$0xff]  ;;  %v68_v9 = vld [vmem:[%s4347_s1 + $0x28] sm:$0xff]  ;;  %v65_v15 = vld [vmem:[%s4347_s1 + $0x10] sm:$0xff]  ;;  %vm2988_vm1 = vcmask 64512  }
  0x27   :  { %v71_v3 = vld [vmem:[%s4347_s1 + $0x40] sm:$0xff]  ;;  %v2997_v4 = vcombine.high %v63_v1, %v67_v2  ;;  %v2996_v5 = vcombine.low %v63_v1, %v67_v2  ;;  %v72_v10 = vld [vmem:[%s4347_s1 + $0x48] sm:$0xff]  ;;  %v2999_v12 = vcombine.high %v64_v7, %v68_v9  ;;  %v2998_v13 = vcombine.low %v64_v7, %v68_v9  ;;  %v69_v16 = vld [vmem:[%s4347_s1 + $0x30] sm:$0xff] }
  0x28   :  { %v75_v6 = vld [vmem:[%s4347_s1 + $0x60] sm:$0xff]  ;;  %v76_v11 = vld [vmem:[%s4347_s1 + $0x68] sm:$0xff]  ;;  %v66_v19 = vld [vmem:[%s4347_s1 + $0x18] sm:$0xff]  ;;  %v3001_v21 = vcombine.high %v65_v15, %v69_v16  ;;  %v3000_v28 = vcombine.low %v65_v15, %v69_v16 }
  0x29   :  { %v3005_v8 = vcombine.high %v71_v3, %v75_v6  ;;  %205 = vmatprep.subr.bf16.mxu0 %v2997_v4  ;;  %v3007_v14 = vcombine.high %v72_v10, %v76_v11  ;;  %v3004_v17 = vcombine.low %v71_v3, %v75_v6  ;;  %v61_v18 = vld [vmem:[%s4346_s0] sm:$0xff]  ;;  %v70_v20 = vld [vmem:[%s4347_s1 + $0x38] sm:$0xff]  ;;  %246 = vmatprep.subr.bf16.mxu1 %v2999_v12  ;;  %v73_v23 = vld [vmem:[%s4347_s1 + $0x50] sm:$0xff] }
  0x2a   :  { %206 = vmatpush1.bf16.msra.mxu0 %v2996_v5  ;;  %247 = vmatpush1.bf16.msra.mxu1 %v2998_v13  ;;  %v3006_v22 = vcombine.low %v72_v10, %v76_v11  ;;  %v77_v24 = vld [vmem:[%s4347_s1 + $0x70] sm:$0xff]  ;;  %v62_v25 = vpack.c.bf16 %v61_v18, %v61_v18  ;;  %v3003_v26 = vcombine.high %v66_v19, %v70_v20  ;;  %v74_v27 = vld [vmem:[%s4347_s1 + $0x58] sm:$0xff] }
  0x2b   :  { %207 = vmatprep.subr.bf16.mxu0 %v3005_v8  ;;  %248 = vmatprep.subr.bf16.mxu1 %v3007_v14  ;;  %v78_v29 = vld [vmem:[%s4347_s1 + $0x78] sm:$0xff]  ;;  %v3009_v30 = vcombine.high %v73_v23, %v77_v24  ;;  %v3002_v31 = vcombine.low %v66_v19, %v70_v20  ;;  %v3008_v33 = vcombine.low %v73_v23, %v77_v24  ;;  %v3456_v34 = vld [vmem:[#allocation2 + $0x4] ss:$16 sps:$4 sm:$0xff]   ;;  %v3454_v37 = vld [vmem:[#allocation2] ss:$16 sps:$4 sm:$0xff]  }
  0x2c   :  { %v3011_v32 = vcombine.high %v74_v27, %v78_v29  ;;  %v3010_v35 = vcombine.low %v74_v27, %v78_v29  ;;  %v3459_v36 = vld [vmem:[#allocation2 + $0xc] ss:$16 sps:$4 sm:$0xff]   ;;  %v3462_v38 = vld [vmem:[#allocation2 + $0x24] ss:$16 sps:$4 sm:$0xff]   ;;  %v3457_v39 = vld [vmem:[#allocation2 + $0x8] ss:$16 sps:$4 sm:$0xff]  }
  0x2d   :  { %v3465_v40 = vld [vmem:[#allocation2 + $0x2c] ss:$16 sps:$4 sm:$0xff]   ;;  %v3460_v41 = vld [vmem:[#allocation2 + $0x20] ss:$16 sps:$4 sm:$0xff]   ;;  %v3468_v42 = vld [vmem:[#allocation2 + $0x44] ss:$16 sps:$4 sm:$0xff]  }
  0x2e   :  { %208 = vmatpush1.bf16.msra.mxu0 %v3004_v17  ;;  %249 = vmatpush1.bf16.msra.mxu1 %v3006_v22  ;;  %v3463_v43 = vld [vmem:[#allocation2 + $0x28] ss:$16 sps:$4 sm:$0xff]   ;;  %v3471_v44 = vld [vmem:[#allocation2 + $0x4c] ss:$16 sps:$4 sm:$0xff]   ;;  %v3466_v45 = vld [vmem:[#allocation2 + $0x40] ss:$16 sps:$4 sm:$0xff]  }
  0x2f   :  { %287 = vmatprep.subr.bf16.mxu0 %v3001_v21  ;;  %328 = vmatprep.subr.bf16.mxu1 %v3003_v26  ;;  %v3474_v46 = vld [vmem:[#allocation2 + $0x64] ss:$16 sps:$4 sm:$0xff]   ;;  %v3469_v47 = vld [vmem:[#allocation2 + $0x48] ss:$16 sps:$4 sm:$0xff]   ;;  %v3477_v48 = vld [vmem:[#allocation2 + $0x6c] ss:$16 sps:$4 sm:$0xff]  }
  0x30   :  { %v3472_v49 = vld [vmem:[#allocation2 + $0x60] ss:$16 sps:$4 sm:$0xff]   ;;  %v3480_v50 = vld [vmem:[#allocation2 + $0x84] ss:$16 sps:$4 sm:$0xff]   ;;  %v3475_v51 = vld [vmem:[#allocation2 + $0x68] ss:$16 sps:$4 sm:$0xff]  }
  0x31   :  { %3012 = vmatmul.mubr.msk.bf16.vlgmr.msra.gmra.mrb[0].mxu0 %vm201_vm0, %v62_v25  ;;  %3013 = vmatmul.mubr.msk.bf16.vlgmr.msra.gmra.mrb[0].mxu1 %vm201_vm0, %v62_v25  ;;  %v3483_v52 = vld [vmem:[#allocation2 + $0x8c] ss:$16 sps:$4 sm:$0xff]   ;;  %v3478_v53 = vld [vmem:[#allocation2 + $0x80] ss:$16 sps:$4 sm:$0xff]   ;;  %v3486_v54 = vld [vmem:[#allocation2 + $0xa4] ss:$16 sps:$4 sm:$0xff]  }
  0x32   :  { %288 = vmatpush1.bf16.msra.mxu0 %v3000_v28  ;;  %319 = vmatprep.mubr.bf16.mxu0 %v3954_v0  ;;  %v3481_v55 = vld [vmem:[#allocation2 + $0x88] ss:$16 sps:$4 sm:$0xff]   ;;  %v3489_v56 = vld [vmem:[#allocation2 + $0xac] ss:$16 sps:$4 sm:$0xff]   ;;  %v3484_v57 = vld [vmem:[#allocation2 + $0xa0] ss:$16 sps:$4 sm:$0xff]  }
  0x33   :  { %289 = vmatprep.subr.bf16.mxu0 %v3009_v30  ;;  %329 = vmatpush1.bf16.msra.mxu1 %v3002_v31  ;;  %v3492_v58 = vld [vmem:[#allocation2 + $0xc4] ss:$16 sps:$4 sm:$0xff]   ;;  %v3487_v59 = vld [vmem:[#allocation2 + $0xa8] ss:$16 sps:$4 sm:$0xff]   ;;  %v3495_v60 = vld [vmem:[#allocation2 + $0xcc] ss:$16 sps:$4 sm:$0xff]  }
  0x34   :  { %360 = vmatprep.mubr.bf16.mxu1 %v3954_v0  ;;  %330 = vmatprep.subr.bf16.mxu1 %v3011_v32  ;;  %v3490_v61 = vld [vmem:[#allocation2 + $0xc0] ss:$16 sps:$4 sm:$0xff]   ;;  %v3493_v62 = vld [vmem:[#allocation2 + $0xc8] ss:$16 sps:$4 sm:$0xff]   ;;  %v3498_v63 = vld [vmem:[#allocation2 + $0xe4] ss:$16 sps:$4 sm:$0xff]  }
  0x35   :  { %v3496_v0 = vld [vmem:[#allocation2 + $0xe0] ss:$16 sps:$4 sm:$0xff]   ;;  %v3501_v1 = vld [vmem:[#allocation2 + $0xec] ss:$16 sps:$4 sm:$0xff]   ;;  %v3504_v2 = vld [vmem:[#allocation2 + $0x104] ss:$16 sps:$4 sm:$0xff]  }
  0x36   :  { %290 = vmatpush1.bf16.msra.mxu0 %v3008_v33  ;;  %v3499_v3 = vld [vmem:[#allocation2 + $0xe8] ss:$16 sps:$4 sm:$0xff]   ;;  %v3507_v4 = vld [vmem:[#allocation2 + $0x10c] ss:$16 sps:$4 sm:$0xff]   ;;  %v3502_v5 = vld [vmem:[#allocation2 + $0x100] ss:$16 sps:$4 sm:$0xff]  }
  0x37   :  { %1175 = vmatprep.subr.bf16.mxu0 %v3456_v34  ;;  %331 = vmatpush1.bf16.msra.mxu1 %v3010_v35  ;;  %v3510_v6 = vld [vmem:[#allocation2 + $0x124] ss:$16 sps:$4 sm:$0xff]   ;;  %v3505_v7 = vld [vmem:[#allocation2 + $0x108] ss:$16 sps:$4 sm:$0xff]   ;;  %v3513_v8 = vld [vmem:[#allocation2 + $0x12c] ss:$16 sps:$4 sm:$0xff]  }
  0x38   :  { %1257 = vmatprep.subr.bf16.mxu1 %v3459_v36  ;;  %v3508_v9 = vld [vmem:[#allocation2 + $0x120] ss:$16 sps:$4 sm:$0xff]   ;;  %v3516_v10 = vld [vmem:[#allocation2 + $0x144] ss:$16 sps:$4 sm:$0xff]   ;;  %v3511_v11 = vld [vmem:[#allocation2 + $0x128] ss:$16 sps:$4 sm:$0xff]  }
  0x39   :  { %3014 = vmatmul.mubr.msk.bf16.vlgmr.msra.gmra.mrb[4].mxu0 %vm201_vm0, %v62_v25  ;;  %v3519_v12 = vld [vmem:[#allocation2 + $0x14c] ss:$16 sps:$4 sm:$0xff]   ;;  %v3514_v13 = vld [vmem:[#allocation2 + $0x140] ss:$16 sps:$4 sm:$0xff]   ;;  %v3522_v14 = vld [vmem:[#allocation2 + $0x164] ss:$16 sps:$4 sm:$0xff]  }
  0x3a   :  { %1176 = vmatpush1.bf16.msra.mxu0 %v3454_v37  ;;  %3015 = vmatmul.mubr.msk.bf16.vlgmr.msra.gmra.mrb[4].mxu1 %vm201_vm0, %v62_v25  ;;  %v3517_v15 = vld [vmem:[#allocation2 + $0x148] ss:$16 sps:$4 sm:$0xff]   ;;  %v3525_v16 = vld [vmem:[#allocation2 + $0x16c] ss:$16 sps:$4 sm:$0xff]   ;;  %v3520_v17 = vld [vmem:[#allocation2 + $0x160] ss:$16 sps:$4 sm:$0xff]   ;;  %v81_v37 = vlaneseq }
  0x3b   :  { %1177 = vmatprep.subr.bf16.mxu0 %v3462_v38  ;;  %1258 = vmatpush1.bf16.msra.mxu1 %v3457_v39  ;;  %v3528_v18 = vld [vmem:[#allocation2 + $0x184] ss:$16 sps:$4 sm:$0xff]   ;;  %v3523_v19 = vld [vmem:[#allocation2 + $0x168] ss:$16 sps:$4 sm:$0xff]   ;;  %v3531_v20 = vld [vmem:[#allocation2 + $0x18c] ss:$16 sps:$4 sm:$0xff]  }
  0x3c   :  { %1259 = vmatprep.subr.bf16.mxu1 %v3465_v40  ;;  %v3526_v21 = vld [vmem:[#allocation2 + $0x180] ss:$16 sps:$4 sm:$0xff]   ;;  %v3534_v22 = vld [vmem:[#allocation2 + $0x1a4] ss:$16 sps:$4 sm:$0xff]   ;;  %v3529_v23 = vld [vmem:[#allocation2 + $0x188] ss:$16 sps:$4 sm:$0xff]  }
  0x3d   :  { %v3537_v24 = vld [vmem:[#allocation2 + $0x1ac] ss:$16 sps:$4 sm:$0xff]   ;;  %v3532_v25 = vld [vmem:[#allocation2 + $0x1a0] ss:$16 sps:$4 sm:$0xff]   ;;  %v3535_v26 = vld [vmem:[#allocation2 + $0x1a8] ss:$16 sps:$4 sm:$0xff]  }
  0x3e   :  { %1178 = vmatpush1.bf16.msra.mxu0 %v3460_v41  ;;  %v3540_v27 = vld [vmem:[#allocation2 + $0x1c4] ss:$16 sps:$4 sm:$0xff]   ;;  %v3543_v28 = vld [vmem:[#allocation2 + $0x1cc] ss:$16 sps:$4 sm:$0xff]   ;;  %v3538_v29 = vld [vmem:[#allocation2 + $0x1c0] ss:$16 sps:$4 sm:$0xff]  }
  0x3f   :  { %1179 = vmatprep.subr.bf16.mxu0 %v3468_v42  ;;  %1260 = vmatpush1.bf16.msra.mxu1 %v3463_v43  ;;  %v3541_v30 = vld [vmem:[#allocation2 + $0x1c8] ss:$16 sps:$4 sm:$0xff]   ;;  %v3546_v31 = vld [vmem:[#allocation2 + $0x1e4] ss:$16 sps:$4 sm:$0xff]   ;;  %v3549_v32 = vld [vmem:[#allocation2 + $0x1ec] ss:$16 sps:$4 sm:$0xff]  }
  0x40   :  { %1261 = vmatprep.subr.bf16.mxu1 %v3471_v44  ;;  %v3544_v33 = vld [vmem:[#allocation2 + $0x1e0] ss:$16 sps:$4 sm:$0xff]   ;;  %v3547_v34 = vld [vmem:[#allocation2 + $0x1e8] ss:$16 sps:$4 sm:$0xff]   ;;  %v3552_v35 = vld [vmem:[#allocation2 + $0x204] ss:$16 sps:$4 sm:$0xff]  }
  0x41   :  { %v3555_v36 = vld [vmem:[#allocation2 + $0x20c] ss:$16 sps:$4 sm:$0xff]   ;;  %v4084_v38 = vshrl.u32 %v81_v37, 7  ;;  %v4092_v40 = vld [vmem:[%s4348_s2] sm:$0xff] }
  0x42   :  { %1180 = vmatpush1.bf16.msra.mxu0 %v3466_v45  ;;  %v3600_v37 = vld [vmem:[#allocation2 + $0x304] ss:$16 sps:$4 sm:$0xff]  }
  0x43   :  { %1181 = vmatprep.subr.bf16.mxu0 %v3474_v46  ;;  %1262 = vmatpush1.bf16.msra.mxu1 %v3469_v47  ;;  %v4087_v39 = vsub.s32 0, %v4084_v38  ;;  %v4095_v41 = vsub.s32 1, %v4084_v38  ;;  %v4098_v42 = vsub.s32 3, %v4084_v38 }
  0x44   :  { %1263 = vmatprep.subr.bf16.mxu1 %v3477_v48 }
  0x45   :  { %v84_v43 = vrot.slane %v4092_v40, %v4087_v39  ;;  %v88_v44 = vrot.slane %v4092_v40, %v4095_v41  ;;  %v96_v46 = vrot.slane %v4092_v40, %v4098_v42 }
  0x46   :  { %1182 = vmatpush1.bf16.msra.mxu0 %v3472_v49 }
  0x47   :  { %1183 = vmatprep.subr.bf16.mxu0 %v3480_v50  ;;  %1264 = vmatpush1.bf16.msra.mxu1 %v3475_v51 }
  0x48   :  { %1265 = vmatprep.subr.bf16.mxu1 %v3483_v52 }
  0x4a   :  { %1184 = vmatpush1.bf16.msra.mxu0 %v3478_v53 }
  0x4b   :  { %1185 = vmatprep.subr.bf16.mxu0 %v3486_v54  ;;  %1266 = vmatpush1.bf16.msra.mxu1 %v3481_v55 }
  0x4c   :  { %1267 = vmatprep.subr.bf16.mxu1 %v3489_v56 }
  0x4e   :  { %1186 = vmatpush1.bf16.msra.mxu0 %v3484_v57 }
  0x4f   :  { %1187 = vmatprep.subr.bf16.mxu0 %v3492_v58  ;;  %1268 = vmatpush1.bf16.msra.mxu1 %v3487_v59 }
  0x50   :  { %1269 = vmatprep.subr.bf16.mxu1 %v3495_v60  ;;  %v3550_v60 = vld [vmem:[#allocation2 + $0x200] ss:$16 sps:$4 sm:$0xff]  }
  0x52   :  { %1188 = vmatpush1.bf16.msra.mxu0 %v3490_v61  ;;  %v3553_v61 = vld [vmem:[#allocation2 + $0x208] ss:$16 sps:$4 sm:$0xff]  }
  0x53   :  { %1189 = vmatprep.subr.bf16.mxu0 %v3498_v63  ;;  %1270 = vmatpush1.bf16.msra.mxu1 %v3493_v62 }
  0x54   :  { %1271 = vmatprep.subr.bf16.mxu1 %v3501_v1  ;;  %v3561_v1 = vld [vmem:[#allocation2 + $0x22c] ss:$16 sps:$4 sm:$0xff]  }
  0x56   :  { %1190 = vmatpush1.bf16.msra.mxu0 %v3496_v0  ;;  %v3558_v0 = vld [vmem:[#allocation2 + $0x224] ss:$16 sps:$4 sm:$0xff]  }
  0x57   :  { %1191 = vmatprep.subr.bf16.mxu0 %v3504_v2  ;;  %1272 = vmatpush1.bf16.msra.mxu1 %v3499_v3 }
  0x58   :  { %1273 = vmatprep.subr.bf16.mxu1 %v3507_v4 }
  0x5a   :  { %1192 = vmatpush1.bf16.msra.mxu0 %v3502_v5  ;;  %v3556_v5 = vld [vmem:[#allocation2 + $0x220] ss:$16 sps:$4 sm:$0xff]  }
  0x5b   :  { %1193 = vmatprep.subr.bf16.mxu0 %v3510_v6  ;;  %1274 = vmatpush1.bf16.msra.mxu1 %v3505_v7  ;;  %v3559_v6 = vld [vmem:[#allocation2 + $0x228] ss:$16 sps:$4 sm:$0xff]  }
  0x5c   :  { %1275 = vmatprep.subr.bf16.mxu1 %v3513_v8  ;;  %v3564_v8 = vld [vmem:[#allocation2 + $0x244] ss:$16 sps:$4 sm:$0xff]  }
  0x5e   :  { %1194 = vmatpush1.bf16.msra.mxu0 %v3508_v9  ;;  %v3567_v9 = vld [vmem:[#allocation2 + $0x24c] ss:$16 sps:$4 sm:$0xff]  }
  0x5f   :  { %1195 = vmatprep.subr.bf16.mxu0 %v3516_v10  ;;  %1276 = vmatpush1.bf16.msra.mxu1 %v3511_v11  ;;  %v3562_v11 = vld [vmem:[#allocation2 + $0x240] ss:$16 sps:$4 sm:$0xff]  }
  0x60   :  { %1277 = vmatprep.subr.bf16.mxu1 %v3519_v12  ;;  %v3565_v12 = vld [vmem:[#allocation2 + $0x248] ss:$16 sps:$4 sm:$0xff]  }
  0x62   :  { %1196 = vmatpush1.bf16.msra.mxu0 %v3514_v13  ;;  %v3570_v13 = vld [vmem:[#allocation2 + $0x264] ss:$16 sps:$4 sm:$0xff]  }
  0x63   :  { %1197 = vmatprep.subr.bf16.mxu0 %v3522_v14  ;;  %1278 = vmatpush1.bf16.msra.mxu1 %v3517_v15  ;;  %v3573_v14 = vld [vmem:[#allocation2 + $0x26c] ss:$16 sps:$4 sm:$0xff]   ;;  %v3568_v15 = vld [vmem:[#allocation2 + $0x260] ss:$16 sps:$4 sm:$0xff]  }
  0x64   :  { %1279 = vmatprep.subr.bf16.mxu1 %v3525_v16  ;;  %v3571_v16 = vld [vmem:[#allocation2 + $0x268] ss:$16 sps:$4 sm:$0xff]  }
  0x66   :  { %1198 = vmatpush1.bf16.msra.mxu0 %v3520_v17  ;;  %v3576_v17 = vld [vmem:[#allocation2 + $0x284] ss:$16 sps:$4 sm:$0xff]  }
  0x67   :  { %1199 = vmatprep.subr.bf16.mxu0 %v3528_v18  ;;  %1280 = vmatpush1.bf16.msra.mxu1 %v3523_v19  ;;  %v3579_v18 = vld [vmem:[#allocation2 + $0x28c] ss:$16 sps:$4 sm:$0xff]   ;;  %v3574_v19 = vld [vmem:[#allocation2 + $0x280] ss:$16 sps:$4 sm:$0xff]  }
  0x68   :  { %1281 = vmatprep.subr.bf16.mxu1 %v3531_v20  ;;  %v3577_v20 = vld [vmem:[#allocation2 + $0x288] ss:$16 sps:$4 sm:$0xff]  }
  0x6a   :  { %1200 = vmatpush1.bf16.msra.mxu0 %v3526_v21  ;;  %v3582_v21 = vld [vmem:[#allocation2 + $0x2a4] ss:$16 sps:$4 sm:$0xff]  }
  0x6b   :  { %1201 = vmatprep.subr.bf16.mxu0 %v3534_v22  ;;  %1282 = vmatpush1.bf16.msra.mxu1 %v3529_v23  ;;  %v3585_v22 = vld [vmem:[#allocation2 + $0x2ac] ss:$16 sps:$4 sm:$0xff]   ;;  %v3580_v23 = vld [vmem:[#allocation2 + $0x2a0] ss:$16 sps:$4 sm:$0xff]  }
  0x6c   :  { %1283 = vmatprep.subr.bf16.mxu1 %v3537_v24  ;;  %v3583_v24 = vld [vmem:[#allocation2 + $0x2a8] ss:$16 sps:$4 sm:$0xff]  }
  0x6e   :  { %1202 = vmatpush1.bf16.msra.mxu0 %v3532_v25 }
  0x6f   :  { %1284 = vmatpush1.bf16.msra.mxu1 %v3535_v26  ;;  %1203 = vmatprep.subr.bf16.mxu0 %v3540_v27  ;;  %v3588_v26 = vld [vmem:[#allocation2 + $0x2c4] ss:$16 sps:$4 sm:$0xff]   ;;  %v3591_v27 = vld [vmem:[#allocation2 + $0x2cc] ss:$16 sps:$4 sm:$0xff]  }
  0x70   :  { %1285 = vmatprep.subr.bf16.mxu1 %v3543_v28 }
  0x72   :  { %1204 = vmatpush1.bf16.msra.mxu0 %v3538_v29 }
  0x73   :  { %1286 = vmatpush1.bf16.msra.mxu1 %v3541_v30  ;;  %1205 = vmatprep.subr.bf16.mxu0 %v3546_v31  ;;  %v3586_v31 = vld [vmem:[#allocation2 + $0x2c0] ss:$16 sps:$4 sm:$0xff]  }
  0x74   :  { %1287 = vmatprep.subr.bf16.mxu1 %v3549_v32  ;;  %v3589_v32 = vld [vmem:[#allocation2 + $0x2c8] ss:$16 sps:$4 sm:$0xff]  }
  0x76   :  { %1206 = vmatpush1.bf16.msra.mxu0 %v3544_v33  ;;  %v3594_v33 = vld [vmem:[#allocation2 + $0x2e4] ss:$16 sps:$4 sm:$0xff]  }
  0x77   :  { %1288 = vmatpush1.bf16.msra.mxu1 %v3547_v34  ;;  %1216 = vmatprep.subr.bf16.mxu0 %v3552_v35  ;;  %v3597_v34 = vld [vmem:[#allocation2 + $0x2ec] ss:$16 sps:$4 sm:$0xff]   ;;  %v3592_v35 = vld [vmem:[#allocation2 + $0x2e0] ss:$16 sps:$4 sm:$0xff]  }
  0x78   :  { %1298 = vmatprep.subr.bf16.mxu1 %v3555_v36  ;;  %v3595_v36 = vld [vmem:[#allocation2 + $0x2e8] ss:$16 sps:$4 sm:$0xff]  }
 0x104   :  { %v239_v45 = vpop.f32.mrb[0].mxu0  ;;  %v4106_v51 = vpop.f32.mrb[0].mxu1 }
 0x105   :  { %v240_v47 = vadd.f32 %v239_v45, %v84_v43  ;;  %v241_v48 = vpop.f32.mrb[1].mxu0  ;;  %v282_v54 = vpop.f32.mrb[1].mxu1  ;;  %v3603_v43 = vld [vmem:[#allocation2 + $0x30c] ss:$16 sps:$4 sm:$0xff]   ;;  %v3601_v45 = vld [vmem:[#allocation2 + $0x308] ss:$16 sps:$4 sm:$0xff]  }
 0x106   :  { %v242_v49 = vadd.f32 %v241_v48, %v88_v44  ;;  %v243_v50 = vpop.f32.mrb[2].mxu0  ;;  %v283_v56 = vadd.f32 %v282_v54, %v96_v46  ;;  %v284_v57 = vpop.f32.mrb[2].mxu1  ;;  %v3598_v44 = vld [vmem:[#allocation2 + $0x300] ss:$16 sps:$4 sm:$0xff]   ;;  %v3606_v46 = vld [vmem:[#allocation2 + $0x324] ss:$16 sps:$4 sm:$0xff]  }
 0x107   :  { %v369_v52 = vmax.f32 %v240_v47, 0.0  ;;  %v244_v53 = vpop.f32.mrb[3].mxu0  ;;  %v285_v58 = vpop.f32.mrb[3].mxu1  ;;  %v3609_v47 = vld [vmem:[#allocation2 + $0x32c] ss:$16 sps:$4 sm:$0xff]  }
 0x108   :  { %v370_v55 = vmax.f32 %v242_v49, 0.0  ;;  %v372_v62 = vmax.f32 %v283_v56, 0.0  ;;  %v3604_v48 = vld [vmem:[#allocation2 + $0x320] ss:$16 sps:$4 sm:$0xff]   ;;  %v3607_v49 = vld [vmem:[#allocation2 + $0x328] ss:$16 sps:$4 sm:$0xff]  }
 0x109   :  { %v377_v63 = vpack.c.bf16 %v369_v52, %v369_v52  ;;  %v3612_v50 = vld [vmem:[#allocation2 + $0x344] ss:$16 sps:$4 sm:$0xff]   ;;  %v3615_v52 = vld [vmem:[#allocation2 + $0x34c] ss:$16 sps:$4 sm:$0xff]   ;;  %v3610_v53 = vld [vmem:[#allocation2 + $0x340] ss:$16 sps:$4 sm:$0xff]  }
 0x10a   :  { %v378_v59 = vpack.c.bf16 %v370_v55, %v370_v55  ;;  %v380_v2 = vpack.c.bf16 %v372_v62, %v372_v62  ;;  %v3613_v54 = vld [vmem:[#allocation2 + $0x348] ss:$16 sps:$4 sm:$0xff]   ;;  %v3618_v55 = vld [vmem:[#allocation2 + $0x364] ss:$16 sps:$4 sm:$0xff]   ;;  %v3621_v56 = vld [vmem:[#allocation2 + $0x36c] ss:$16 sps:$4 sm:$0xff]  }
 0x10b   :  { %v3616_v57 = vld [vmem:[#allocation2 + $0x360] ss:$16 sps:$4 sm:$0xff]   ;;  %v3619_v58 = vld [vmem:[#allocation2 + $0x368] ss:$16 sps:$4 sm:$0xff]  }
 0x10c   :  { %1207 = vmatprep.mubr.bf16.mxu0 %v378_v59  ;;  %1289 = vmatprep.mubr.bf16.mxu1 %v378_v59  ;;  %v4108_v3 = vpop.f32.mrb[4].mxu0  ;;  %v3624_v59 = vld [vmem:[#allocation2 + $0x384] ss:$16 sps:$4 sm:$0xff]   ;;  %v3622_v62 = vld [vmem:[#allocation2 + $0x380] ss:$16 sps:$4 sm:$0xff]  }
 0x10d   :  { %1208 = vmatmul.mubr.bf16.vlgmr.msra.gmra.mrb[8].mxu0 %v377_v63  ;;  %1290 = vmatmul.mubr.bf16.vlgmr.msra.gmra.mrb[8].mxu1 %v377_v63  ;;  %v4110_v4 = vpop.f32.mrb[5].mxu0  ;;  %v4112_v25 = vpop.f32.mrb[4].mxu1  ;;  %v3625_v63 = vld [vmem:[#allocation2 + $0x388] ss:$16 sps:$4 sm:$0xff]  }
 0x10e   :  { %1217 = vmatpush1.bf16.msra.mxu0 %v3550_v60  ;;  %1299 = vmatpush1.bf16.msra.mxu1 %v3553_v61  ;;  %v325_v7 = vpop.f32.mrb[6].mxu0  ;;  %v4114_v28 = vpop.f32.mrb[5].mxu1  ;;  %v3627_v60 = vld [vmem:[#allocation2 + $0x38c] ss:$16 sps:$4 sm:$0xff]   ;;  %v4117_v61 = vsub.s32 2, %v4084_v38 }
 0x10f   :  { %1218 = vmatprep.subr.bf16.mxu0 %v3558_v0  ;;  %1300 = vmatprep.subr.bf16.mxu1 %v3561_v1  ;;  %v326_v10 = vpop.f32.mrb[7].mxu0  ;;  %v366_v29 = vpop.f32.mrb[6].mxu1  ;;  %v3630_v0 = vld [vmem:[#allocation2 + $0x3a4] ss:$16 sps:$4 sm:$0xff]   ;;  %v3633_v1 = vld [vmem:[#allocation2 + $0x3ac] ss:$16 sps:$4 sm:$0xff]  }
 0x110   :  { %1248 = vmatprep.mubr.bf16.mxu0 %v380_v2  ;;  %1330 = vmatprep.mubr.bf16.mxu1 %v380_v2  ;;  %v367_v30 = vpop.f32.mrb[7].mxu1  ;;  %v103_v2 = vsub.s32 5, %v4084_v38  ;;  %v3631_v7 = vld [vmem:[#allocation2 + $0x3a8] ss:$16 sps:$4 sm:$0xff]   ;;  %v3652_v29 = vld [vmem:[#allocation4 + $0x20] ss:$16 sps:$4 sm:$0xff]  }
 0x111   :  { %v3655_v30 = vld [vmem:[#allocation4 + $0x28] ss:$16 sps:$4 sm:$0xff]  }
 0x112   :  { %1219 = vmatpush1.bf16.msra.mxu0 %v3556_v5  ;;  %1301 = vmatpush1.bf16.msra.mxu1 %v3559_v6  ;;  %v92_v5 = vrot.slane %v4092_v40, %v4117_v61  ;;  %v3628_v6 = vld [vmem:[#allocation2 + $0x3a0] ss:$16 sps:$4 sm:$0xff]   ;;  %v104_v10 = vrot.slane %v4092_v40, %v103_v2  ;;  %v3702_v2 = vld [vmem:[#allocation4 + $0x124] ss:$16 sps:$4 sm:$0xff]  }
 0x113   :  { %1220 = vmatprep.subr.bf16.mxu0 %v3564_v8  ;;  %1302 = vmatprep.subr.bf16.mxu1 %v3567_v9  ;;  %v3636_v8 = vld [vmem:[#allocation2 + $0x3c4] ss:$16 sps:$4 sm:$0xff]   ;;  %v3639_v9 = vld [vmem:[#allocation2 + $0x3cc] ss:$16 sps:$4 sm:$0xff]  }
 0x116   :  { %1221 = vmatpush1.bf16.msra.mxu0 %v3562_v11  ;;  %1303 = vmatpush1.bf16.msra.mxu1 %v3565_v12  ;;  %v281_v11 = vadd.f32 %v4106_v51, %v92_v5  ;;  %v3634_v12 = vld [vmem:[#allocation2 + $0x3c0] ss:$16 sps:$4 sm:$0xff]   ;;  %v3705_v5 = vld [vmem:[#allocation4 + $0x12c] ss:$16 sps:$4 sm:$0xff]  }
 0x117   :  { %1222 = vmatprep.subr.bf16.mxu0 %v3570_v13  ;;  %1304 = vmatprep.subr.bf16.mxu1 %v3573_v14  ;;  %v3637_v13 = vld [vmem:[#allocation2 + $0x3c8] ss:$16 sps:$4 sm:$0xff]   ;;  %v3642_v14 = vld [vmem:[#allocation2 + $0x3e4] ss:$16 sps:$4 sm:$0xff]  }
 0x11a   :  { %1223 = vmatpush1.bf16.msra.mxu0 %v3568_v15  ;;  %1305 = vmatpush1.bf16.msra.mxu1 %v3571_v16  ;;  %v3645_v15 = vld [vmem:[#allocation2 + $0x3ec] ss:$16 sps:$4 sm:$0xff]   ;;  %v324_v16 = vadd.f32 %v4110_v4, %v104_v10  ;;  %v3706_v10 = vld [vmem:[#allocation4 + $0x140] ss:$16 sps:$4 sm:$0xff]  }
 0x11b   :  { %1224 = vmatprep.subr.bf16.mxu0 %v3576_v17  ;;  %1306 = vmatprep.subr.bf16.mxu1 %v3579_v18  ;;  %v371_v17 = vmax.f32 %v281_v11, 0.0  ;;  %v3640_v18 = vld [vmem:[#allocation2 + $0x3e0] ss:$16 sps:$4 sm:$0xff]   ;;  %v3709_v11 = vld [vmem:[#allocation4 + $0x148] ss:$16 sps:$4 sm:$0xff]  }
 0x11c   :  { %v374_v51 = vmax.f32 %v324_v16, 0.0  ;;  %v3720_v16 = vld [vmem:[#allocation4 + $0x184] ss:$16 sps:$4 sm:$0xff]  }
 0x11e   :  { %1225 = vmatpush1.bf16.msra.mxu0 %v3574_v19  ;;  %1307 = vmatpush1.bf16.msra.mxu1 %v3577_v20  ;;  %v3643_v19 = vld [vmem:[#allocation2 + $0x3e8] ss:$16 sps:$4 sm:$0xff]   ;;  %v3648_v20 = vld [vmem:[#allocation4 + $0x4] ss:$16 sps:$4 sm:$0xff]   ;;  %v382_v4 = vpack.c.bf16 %v374_v51, %v374_v51  ;;  %v3729_v51 = vld [vmem:[#allocation4 + $0x1ac] ss:$16 sps:$4 sm:$0xff]  }
 0x11f   :  { %1226 = vmatprep.subr.bf16.mxu0 %v3582_v21  ;;  %1308 = vmatprep.subr.bf16.mxu1 %v3585_v22  ;;  %v3651_v21 = vld [vmem:[#allocation4 + $0xc] ss:$16 sps:$4 sm:$0xff]   ;;  %v379_v22 = vpack.c.bf16 %v371_v17, %v371_v17 }
 0x120   :  { %v3723_v17 = vld [vmem:[#allocation4 + $0x18c] ss:$16 sps:$4 sm:$0xff]  }
 0x122   :  { %1227 = vmatpush1.bf16.msra.mxu0 %v3580_v23  ;;  %1309 = vmatpush1.bf16.msra.mxu1 %v3583_v24  ;;  %v3646_v23 = vld [vmem:[#allocation4] ss:$16 sps:$4 sm:$0xff]   ;;  %v3649_v24 = vld [vmem:[#allocation4 + $0x8] ss:$16 sps:$4 sm:$0xff]  }
 0x123   :  { %1228 = vmatprep.subr.bf16.mxu0 %v3588_v26  ;;  %1310 = vmatprep.subr.bf16.mxu1 %v3591_v27  ;;  %v3654_v26 = vld [vmem:[#allocation4 + $0x24] ss:$16 sps:$4 sm:$0xff]   ;;  %v3657_v27 = vld [vmem:[#allocation4 + $0x2c] ss:$16 sps:$4 sm:$0xff]  }
 0x126   :  { %1229 = vmatpush1.bf16.msra.mxu0 %v3586_v31  ;;  %1311 = vmatpush1.bf16.msra.mxu1 %v3589_v32  ;;  %v3660_v31 = vld [vmem:[#allocation4 + $0x44] ss:$16 sps:$4 sm:$0xff]   ;;  %v3663_v32 = vld [vmem:[#allocation4 + $0x4c] ss:$16 sps:$4 sm:$0xff]  }
 0x127   :  { %1230 = vmatprep.subr.bf16.mxu0 %v3594_v33  ;;  %1312 = vmatprep.subr.bf16.mxu1 %v3597_v34  ;;  %v3658_v33 = vld [vmem:[#allocation4 + $0x40] ss:$16 sps:$4 sm:$0xff]   ;;  %v3661_v34 = vld [vmem:[#allocation4 + $0x48] ss:$16 sps:$4 sm:$0xff]  }
 0x12a   :  { %1231 = vmatpush1.bf16.msra.mxu0 %v3592_v35  ;;  %1313 = vmatpush1.bf16.msra.mxu1 %v3595_v36  ;;  %v3666_v35 = vld [vmem:[#allocation4 + $0x64] ss:$16 sps:$4 sm:$0xff]   ;;  %v3669_v36 = vld [vmem:[#allocation4 + $0x6c] ss:$16 sps:$4 sm:$0xff]  }
 0x12b   :  { %1232 = vmatprep.subr.bf16.mxu0 %v3600_v37  ;;  %1314 = vmatprep.subr.bf16.mxu1 %v3603_v43  ;;  %v3664_v37 = vld [vmem:[#allocation4 + $0x60] ss:$16 sps:$4 sm:$0xff]   ;;  %v3667_v43 = vld [vmem:[#allocation4 + $0x68] ss:$16 sps:$4 sm:$0xff]  }
 0x12e   :  { %1233 = vmatpush1.bf16.msra.mxu0 %v3598_v44  ;;  %1315 = vmatpush1.bf16.msra.mxu1 %v3601_v45  ;;  %v3672_v44 = vld [vmem:[#allocation4 + $0x84] ss:$16 sps:$4 sm:$0xff]   ;;  %v3675_v45 = vld [vmem:[#allocation4 + $0x8c] ss:$16 sps:$4 sm:$0xff]  }
 0x12f   :  { %1234 = vmatprep.subr.bf16.mxu0 %v3606_v46  ;;  %1316 = vmatprep.subr.bf16.mxu1 %v3609_v47  ;;  %v3670_v46 = vld [vmem:[#allocation4 + $0x80] ss:$16 sps:$4 sm:$0xff]   ;;  %v3673_v47 = vld [vmem:[#allocation4 + $0x88] ss:$16 sps:$4 sm:$0xff]  }
 0x132   :  { %1235 = vmatpush1.bf16.msra.mxu0 %v3604_v48  ;;  %1317 = vmatpush1.bf16.msra.mxu1 %v3607_v49  ;;  %v3678_v48 = vld [vmem:[#allocation4 + $0xa4] ss:$16 sps:$4 sm:$0xff]   ;;  %v3681_v49 = vld [vmem:[#allocation4 + $0xac] ss:$16 sps:$4 sm:$0xff]  }
 0x133   :  { %1236 = vmatprep.subr.bf16.mxu0 %v3612_v50  ;;  %1318 = vmatprep.subr.bf16.mxu1 %v3615_v52  ;;  %v3676_v50 = vld [vmem:[#allocation4 + $0xa0] ss:$16 sps:$4 sm:$0xff]   ;;  %v3679_v52 = vld [vmem:[#allocation4 + $0xa8] ss:$16 sps:$4 sm:$0xff]  }
 0x136   :  { %1237 = vmatpush1.bf16.msra.mxu0 %v3610_v53  ;;  %1319 = vmatpush1.bf16.msra.mxu1 %v3613_v54  ;;  %v3684_v53 = vld [vmem:[#allocation4 + $0xc4] ss:$16 sps:$4 sm:$0xff]   ;;  %v3687_v54 = vld [vmem:[#allocation4 + $0xcc] ss:$16 sps:$4 sm:$0xff]  }
 0x137   :  { %1238 = vmatprep.subr.bf16.mxu0 %v3618_v55  ;;  %1320 = vmatprep.subr.bf16.mxu1 %v3621_v56  ;;  %v3682_v55 = vld [vmem:[#allocation4 + $0xc0] ss:$16 sps:$4 sm:$0xff]   ;;  %v3685_v56 = vld [vmem:[#allocation4 + $0xc8] ss:$16 sps:$4 sm:$0xff]  }
 0x13a   :  { %1239 = vmatpush1.bf16.msra.mxu0 %v3616_v57  ;;  %1321 = vmatpush1.bf16.msra.mxu1 %v3619_v58  ;;  %v3690_v57 = vld [vmem:[#allocation4 + $0xe4] ss:$16 sps:$4 sm:$0xff]   ;;  %v3693_v58 = vld [vmem:[#allocation4 + $0xec] ss:$16 sps:$4 sm:$0xff]  }
 0x13b   :  { %1240 = vmatprep.subr.bf16.mxu0 %v3624_v59  ;;  %1322 = vmatprep.subr.bf16.mxu1 %v3627_v60  ;;  %v3688_v59 = vld [vmem:[#allocation4 + $0xe0] ss:$16 sps:$4 sm:$0xff]   ;;  %v3691_v60 = vld [vmem:[#allocation4 + $0xe8] ss:$16 sps:$4 sm:$0xff]  }
 0x13e   :  { %1241 = vmatpush1.bf16.msra.mxu0 %v3622_v62  ;;  %1323 = vmatpush1.bf16.msra.mxu1 %v3625_v63  ;;  %v3696_v62 = vld [vmem:[#allocation4 + $0x104] ss:$16 sps:$4 sm:$0xff]   ;;  %v3699_v63 = vld [vmem:[#allocation4 + $0x10c] ss:$16 sps:$4 sm:$0xff]  }
 0x13f   :  { %1242 = vmatprep.subr.bf16.mxu0 %v3630_v0  ;;  %1324 = vmatprep.subr.bf16.mxu1 %v3633_v1  ;;  %v3694_v0 = vld [vmem:[#allocation4 + $0x100] ss:$16 sps:$4 sm:$0xff]   ;;  %v3697_v1 = vld [vmem:[#allocation4 + $0x108] ss:$16 sps:$4 sm:$0xff]  }
 0x142   :  { %1243 = vmatpush1.bf16.msra.mxu0 %v3628_v6  ;;  %1325 = vmatpush1.bf16.msra.mxu1 %v3631_v7  ;;  %v3700_v6 = vld [vmem:[#allocation4 + $0x120] ss:$16 sps:$4 sm:$0xff]   ;;  %v3703_v7 = vld [vmem:[#allocation4 + $0x128] ss:$16 sps:$4 sm:$0xff]  }
 0x143   :  { %1244 = vmatprep.subr.bf16.mxu0 %v3636_v8  ;;  %1326 = vmatprep.subr.bf16.mxu1 %v3639_v9  ;;  %v3708_v8 = vld [vmem:[#allocation4 + $0x144] ss:$16 sps:$4 sm:$0xff]   ;;  %v3711_v9 = vld [vmem:[#allocation4 + $0x14c] ss:$16 sps:$4 sm:$0xff]  }
 0x146   :  { %1245 = vmatpush1.bf16.msra.mxu0 %v3634_v12  ;;  %1327 = vmatpush1.bf16.msra.mxu1 %v3637_v13  ;;  %v3714_v12 = vld [vmem:[#allocation4 + $0x164] ss:$16 sps:$4 sm:$0xff]   ;;  %v3717_v13 = vld [vmem:[#allocation4 + $0x16c] ss:$16 sps:$4 sm:$0xff]  }
 0x147   :  { %1246 = vmatprep.subr.bf16.mxu0 %v3642_v14  ;;  %1328 = vmatprep.subr.bf16.mxu1 %v3645_v15  ;;  %v3712_v14 = vld [vmem:[#allocation4 + $0x160] ss:$16 sps:$4 sm:$0xff]   ;;  %v3715_v15 = vld [vmem:[#allocation4 + $0x168] ss:$16 sps:$4 sm:$0xff]  }
 0x14a   :  { %1247 = vmatpush1.bf16.msra.mxu0 %v3640_v18  ;;  %1329 = vmatpush1.bf16.msra.mxu1 %v3643_v19  ;;  %v99_v18 = vsub.s32 4, %v4084_v38  ;;  %v3718_v19 = vld [vmem:[#allocation4 + $0x180] ss:$16 sps:$4 sm:$0xff]  }
 0x14b   :  { %2133 = vmatprep.subr.bf16.mxu0 %v3648_v20  ;;  %2215 = vmatprep.subr.bf16.mxu1 %v3651_v21  ;;  %v3721_v20 = vld [vmem:[#allocation4 + $0x188] ss:$16 sps:$4 sm:$0xff]   ;;  %v3726_v21 = vld [vmem:[#allocation4 + $0x1a4] ss:$16 sps:$4 sm:$0xff]  }
 0x14d   :  { %1249 = vmatmul.mubr.bf16.vlgmr.msra.gmra.mrb[8].mxu0 %v379_v22  ;;  %1331 = vmatmul.mubr.bf16.vlgmr.msra.gmra.mrb[8].mxu1 %v379_v22  ;;  %v111_v22 = vsub.s32 7, %v4084_v38 }
 0x14e   :  { %2134 = vmatpush1.bf16.msra.mxu0 %v3646_v23  ;;  %2216 = vmatpush1.bf16.msra.mxu1 %v3649_v24  ;;  %v100_v23 = vrot.slane %v4092_v40, %v99_v18  ;;  %v3724_v24 = vld [vmem:[#allocation4 + $0x1a0] ss:$16 sps:$4 sm:$0xff]   ;;  %v3795_v18 = vld [vmem:[#allocation4 + $0x30c] ss:$16 sps:$4 sm:$0xff]  }
 0x14f   :  { %2135 = vmatprep.subr.bf16.mxu0 %v3654_v26  ;;  %2217 = vmatprep.subr.bf16.mxu1 %v3657_v27  ;;  %v3727_v26 = vld [vmem:[#allocation4 + $0x1a8] ss:$16 sps:$4 sm:$0xff]   ;;  %v3732_v27 = vld [vmem:[#allocation4 + $0x1c4] ss:$16 sps:$4 sm:$0xff]  }
 0x150   :  { %2165 = vmatprep.mubr.bf16.mxu0 %v382_v4  ;;  %2247 = vmatprep.mubr.bf16.mxu1 %v382_v4  ;;  %v3735_v4 = vld [vmem:[#allocation4 + $0x1cc] ss:$16 sps:$4 sm:$0xff]  }
 0x152   :  { %2136 = vmatpush1.bf16.msra.mxu0 %v3652_v29  ;;  %2218 = vmatpush1.bf16.msra.mxu1 %v3655_v30  ;;  %v112_v29 = vrot.slane %v4092_v40, %v111_v22  ;;  %v322_v30 = vadd.f32 %v4108_v3, %v100_v23  ;;  %v3796_v22 = vld [vmem:[#allocation4 + $0x320] ss:$16 sps:$4 sm:$0xff]   ;;  %v3799_v23 = vld [vmem:[#allocation4 + $0x328] ss:$16 sps:$4 sm:$0xff]  }
 0x153   :  { %2137 = vmatprep.subr.bf16.mxu0 %v3660_v31  ;;  %2219 = vmatprep.subr.bf16.mxu1 %v3663_v32  ;;  %v3730_v31 = vld [vmem:[#allocation4 + $0x1c0] ss:$16 sps:$4 sm:$0xff]   ;;  %v3733_v32 = vld [vmem:[#allocation4 + $0x1c8] ss:$16 sps:$4 sm:$0xff]  }
 0x156   :  { %2138 = vmatpush1.bf16.msra.mxu0 %v3658_v33  ;;  %2220 = vmatpush1.bf16.msra.mxu1 %v3661_v34  ;;  %v3738_v33 = vld [vmem:[#allocation4 + $0x1e4] ss:$16 sps:$4 sm:$0xff]   ;;  %v3741_v34 = vld [vmem:[#allocation4 + $0x1ec] ss:$16 sps:$4 sm:$0xff]  }
 0x157   :  { %2139 = vmatprep.subr.bf16.mxu0 %v3666_v35  ;;  %2221 = vmatprep.subr.bf16.mxu1 %v3669_v36  ;;  %v365_v35 = vadd.f32 %v4114_v28, %v112_v29  ;;  %v373_v36 = vmax.f32 %v322_v30, 0.0  ;;  %v3810_v29 = vld [vmem:[#allocation4 + $0x364] ss:$16 sps:$4 sm:$0xff]   ;;  %v3813_v30 = vld [vmem:[#allocation4 + $0x36c] ss:$16 sps:$4 sm:$0xff]  }
 0x159   :  { %v376_v3 = vmax.f32 %v365_v35, 0.0  ;;  %v3814_v35 = vld [vmem:[#allocation4 + $0x380] ss:$16 sps:$4 sm:$0xff]  }
 0x15a   :  { %2140 = vmatpush1.bf16.msra.mxu0 %v3664_v37  ;;  %2222 = vmatpush1.bf16.msra.mxu1 %v3667_v43  ;;  %v3736_v37 = vld [vmem:[#allocation4 + $0x1e0] ss:$16 sps:$4 sm:$0xff]   ;;  %v3739_v43 = vld [vmem:[#allocation4 + $0x1e8] ss:$16 sps:$4 sm:$0xff]  }
 0x15b   :  { %2141 = vmatprep.subr.bf16.mxu0 %v3672_v44  ;;  %2223 = vmatprep.subr.bf16.mxu1 %v3675_v45  ;;  %v3744_v44 = vld [vmem:[#allocation4 + $0x204] ss:$16 sps:$4 sm:$0xff]   ;;  %v3747_v45 = vld [vmem:[#allocation4 + $0x20c] ss:$16 sps:$4 sm:$0xff]   ;;  %v384_v28 = vpack.c.bf16 %v376_v3, %v376_v3  ;;  %v3823_v3 = vld [vmem:[#allocation4 + $0x3a8] ss:$16 sps:$4 sm:$0xff]  }
 0x15e   :  { %2142 = vmatpush1.bf16.msra.mxu0 %v3670_v46  ;;  %2224 = vmatpush1.bf16.msra.mxu1 %v3673_v47  ;;  %v381_v46 = vpack.c.bf16 %v373_v36, %v373_v36  ;;  %v3742_v47 = vld [vmem:[#allocation4 + $0x200] ss:$16 sps:$4 sm:$0xff]   ;;  %v3817_v36 = vld [vmem:[#allocation4 + $0x388] ss:$16 sps:$4 sm:$0xff]  }
 0x15f   :  { %2143 = vmatprep.subr.bf16.mxu0 %v3678_v48  ;;  %2225 = vmatprep.subr.bf16.mxu1 %v3681_v49  ;;  %v3745_v48 = vld [vmem:[#allocation4 + $0x208] ss:$16 sps:$4 sm:$0xff]   ;;  %v3750_v49 = vld [vmem:[#allocation4 + $0x224] ss:$16 sps:$4 sm:$0xff]  }
 0x162   :  { %2144 = vmatpush1.bf16.msra.mxu0 %v3676_v50  ;;  %2226 = vmatpush1.bf16.msra.mxu1 %v3679_v52  ;;  %v3753_v50 = vld [vmem:[#allocation4 + $0x22c] ss:$16 sps:$4 sm:$0xff]   ;;  %v3748_v52 = vld [vmem:[#allocation4 + $0x220] ss:$16 sps:$4 sm:$0xff]  }
 0x163   :  { %2145 = vmatprep.subr.bf16.mxu0 %v3684_v53  ;;  %2227 = vmatprep.subr.bf16.mxu1 %v3687_v54  ;;  %v3751_v53 = vld [vmem:[#allocation4 + $0x228] ss:$16 sps:$4 sm:$0xff]   ;;  %v3756_v54 = vld [vmem:[#allocation4 + $0x244] ss:$16 sps:$4 sm:$0xff]  }
 0x166   :  { %2146 = vmatpush1.bf16.msra.mxu0 %v3682_v55  ;;  %2228 = vmatpush1.bf16.msra.mxu1 %v3685_v56  ;;  %v3759_v55 = vld [vmem:[#allocation4 + $0x24c] ss:$16 sps:$4 sm:$0xff]   ;;  %v3754_v56 = vld [vmem:[#allocation4 + $0x240] ss:$16 sps:$4 sm:$0xff]  }
 0x167   :  { %2147 = vmatprep.subr.bf16.mxu0 %v3690_v57  ;;  %2229 = vmatprep.subr.bf16.mxu1 %v3693_v58  ;;  %v3757_v57 = vld [vmem:[#allocation4 + $0x248] ss:$16 sps:$4 sm:$0xff]   ;;  %v3762_v58 = vld [vmem:[#allocation4 + $0x264] ss:$16 sps:$4 sm:$0xff]  }
 0x16a   :  { %2148 = vmatpush1.bf16.msra.mxu0 %v3688_v59  ;;  %2230 = vmatpush1.bf16.msra.mxu1 %v3691_v60  ;;  %v3765_v59 = vld [vmem:[#allocation4 + $0x26c] ss:$16 sps:$4 sm:$0xff]   ;;  %v3760_v60 = vld [vmem:[#allocation4 + $0x260] ss:$16 sps:$4 sm:$0xff]  }
 0x16b   :  { %2149 = vmatprep.subr.bf16.mxu0 %v3696_v62  ;;  %2231 = vmatprep.subr.bf16.mxu1 %v3699_v63  ;;  %v3763_v62 = vld [vmem:[#allocation4 + $0x268] ss:$16 sps:$4 sm:$0xff]   ;;  %v3768_v63 = vld [vmem:[#allocation4 + $0x284] ss:$16 sps:$4 sm:$0xff]  }
 0x16e   :  { %2150 = vmatpush1.bf16.msra.mxu0 %v3694_v0  ;;  %2232 = vmatpush1.bf16.msra.mxu1 %v3697_v1  ;;  %v3771_v0 = vld [vmem:[#allocation4 + $0x28c] ss:$16 sps:$4 sm:$0xff]   ;;  %v3766_v1 = vld [vmem:[#allocation4 + $0x280] ss:$16 sps:$4 sm:$0xff]  }
 0x16f   :  { %2151 = vmatprep.subr.bf16.mxu0 %v3702_v2  ;;  %2233 = vmatprep.subr.bf16.mxu1 %v3705_v5  ;;  %v3769_v2 = vld [vmem:[#allocation4 + $0x288] ss:$16 sps:$4 sm:$0xff]   ;;  %v3774_v5 = vld [vmem:[#allocation4 + $0x2a4] ss:$16 sps:$4 sm:$0xff]  }
 0x172   :  { %2152 = vmatpush1.bf16.msra.mxu0 %v3700_v6  ;;  %2234 = vmatpush1.bf16.msra.mxu1 %v3703_v7  ;;  %v3777_v6 = vld [vmem:[#allocation4 + $0x2ac] ss:$16 sps:$4 sm:$0xff]   ;;  %v3772_v7 = vld [vmem:[#allocation4 + $0x2a0] ss:$16 sps:$4 sm:$0xff]  }
 0x173   :  { %2153 = vmatprep.subr.bf16.mxu0 %v3708_v8  ;;  %2235 = vmatprep.subr.bf16.mxu1 %v3711_v9  ;;  %v3775_v8 = vld [vmem:[#allocation4 + $0x2a8] ss:$16 sps:$4 sm:$0xff]   ;;  %v3780_v9 = vld [vmem:[#allocation4 + $0x2c4] ss:$16 sps:$4 sm:$0xff]  }
 0x176   :  { %2154 = vmatpush1.bf16.msra.mxu0 %v3706_v10  ;;  %2236 = vmatpush1.bf16.msra.mxu1 %v3709_v11  ;;  %v3783_v10 = vld [vmem:[#allocation4 + $0x2cc] ss:$16 sps:$4 sm:$0xff]   ;;  %v3778_v11 = vld [vmem:[#allocation4 + $0x2c0] ss:$16 sps:$4 sm:$0xff]  }
 0x177   :  { %2155 = vmatprep.subr.bf16.mxu0 %v3714_v12  ;;  %2237 = vmatprep.subr.bf16.mxu1 %v3717_v13  ;;  %v3781_v12 = vld [vmem:[#allocation4 + $0x2c8] ss:$16 sps:$4 sm:$0xff]   ;;  %v3786_v13 = vld [vmem:[#allocation4 + $0x2e4] ss:$16 sps:$4 sm:$0xff]  }
 0x17a   :  { %2156 = vmatpush1.bf16.msra.mxu0 %v3712_v14  ;;  %2238 = vmatpush1.bf16.msra.mxu1 %v3715_v15  ;;  %v3789_v14 = vld [vmem:[#allocation4 + $0x2ec] ss:$16 sps:$4 sm:$0xff]   ;;  %v3784_v15 = vld [vmem:[#allocation4 + $0x2e0] ss:$16 sps:$4 sm:$0xff]  }
 0x17b   :  { %2157 = vmatprep.subr.bf16.mxu0 %v3720_v16  ;;  %2239 = vmatprep.subr.bf16.mxu1 %v3723_v17  ;;  %v3787_v16 = vld [vmem:[#allocation4 + $0x2e8] ss:$16 sps:$4 sm:$0xff]   ;;  %v3792_v17 = vld [vmem:[#allocation4 + $0x304] ss:$16 sps:$4 sm:$0xff]  }
 0x17e   :  { %2158 = vmatpush1.bf16.msra.mxu0 %v3718_v19  ;;  %2240 = vmatpush1.bf16.msra.mxu1 %v3721_v20  ;;  %v3790_v19 = vld [vmem:[#allocation4 + $0x300] ss:$16 sps:$4 sm:$0xff]   ;;  %v3793_v20 = vld [vmem:[#allocation4 + $0x308] ss:$16 sps:$4 sm:$0xff]  }
 0x17f   :  { %2159 = vmatprep.subr.bf16.mxu0 %v3726_v21  ;;  %2241 = vmatprep.subr.bf16.mxu1 %v3729_v51  ;;  %v3798_v21 = vld [vmem:[#allocation4 + $0x324] ss:$16 sps:$4 sm:$0xff]   ;;  %v3801_v51 = vld [vmem:[#allocation4 + $0x32c] ss:$16 sps:$4 sm:$0xff]  }
 0x182   :  { %2160 = vmatpush1.bf16.msra.mxu0 %v3724_v24  ;;  %2242 = vmatpush1.bf16.msra.mxu1 %v3727_v26  ;;  %v3804_v24 = vld [vmem:[#allocation4 + $0x344] ss:$16 sps:$4 sm:$0xff]   ;;  %v3807_v26 = vld [vmem:[#allocation4 + $0x34c] ss:$16 sps:$4 sm:$0xff]  }
 0x183   :  { %2161 = vmatprep.subr.bf16.mxu0 %v3732_v27  ;;  %2243 = vmatprep.subr.bf16.mxu1 %v3735_v4  ;;  %v3802_v27 = vld [vmem:[#allocation4 + $0x340] ss:$16 sps:$4 sm:$0xff]   ;;  %v3805_v4 = vld [vmem:[#allocation4 + $0x348] ss:$16 sps:$4 sm:$0xff]  }
 0x186   :  { %2162 = vmatpush1.bf16.msra.mxu0 %v3730_v31  ;;  %2244 = vmatpush1.bf16.msra.mxu1 %v3733_v32  ;;  %v3808_v31 = vld [vmem:[#allocation4 + $0x360] ss:$16 sps:$4 sm:$0xff]   ;;  %v3811_v32 = vld [vmem:[#allocation4 + $0x368] ss:$16 sps:$4 sm:$0xff]  }
 0x187   :  { %2163 = vmatprep.subr.bf16.mxu0 %v3738_v33  ;;  %2245 = vmatprep.subr.bf16.mxu1 %v3741_v34  ;;  %v3816_v33 = vld [vmem:[#allocation4 + $0x384] ss:$16 sps:$4 sm:$0xff]   ;;  %v3819_v34 = vld [vmem:[#allocation4 + $0x38c] ss:$16 sps:$4 sm:$0xff]  }
 0x18a   :  { %2164 = vmatpush1.bf16.msra.mxu0 %v3736_v37  ;;  %2246 = vmatpush1.bf16.msra.mxu1 %v3739_v43  ;;  %v107_v37 = vsub.s32 6, %v4084_v38  ;;  %v3822_v43 = vld [vmem:[#allocation4 + $0x3a4] ss:$16 sps:$4 sm:$0xff]  }
 0x18b   :  { %2174 = vmatprep.subr.bf16.mxu0 %v3744_v44  ;;  %2256 = vmatprep.subr.bf16.mxu1 %v3747_v45  ;;  %v3825_v44 = vld [vmem:[#allocation4 + $0x3ac] ss:$16 sps:$4 sm:$0xff]   ;;  %v3820_v45 = vld [vmem:[#allocation4 + $0x3a0] ss:$16 sps:$4 sm:$0xff]  }
 0x18d   :  { %2166 = vmatmul.mubr.bf16.vlgmr.msra.gmra.mrb[12].mxu0 %v381_v46  ;;  %2248 = vmatmul.mubr.bf16.vlgmr.msra.gmra.mrb[12].mxu1 %v381_v46  ;;  %v108_v46 = vrot.slane %v4092_v40, %v107_v37  ;;  %v3838_v40 = vld [vmem:[%s4353_s7 + $0x40] sm:$0xff]  }
 0x18e   :  { %2175 = vmatpush1.bf16.msra.mxu0 %v3742_v47  ;;  %2257 = vmatpush1.bf16.msra.mxu1 %v3745_v48  ;;  %v3828_v47 = vld [vmem:[#allocation4 + $0x3c4] ss:$16 sps:$4 sm:$0xff]   ;;  %v3831_v48 = vld [vmem:[#allocation4 + $0x3cc] ss:$16 sps:$4 sm:$0xff]  }
 0x18f   :  { %2176 = vmatprep.subr.bf16.mxu0 %v3750_v49  ;;  %2258 = vmatprep.subr.bf16.mxu1 %v3753_v50  ;;  %v3826_v49 = vld [vmem:[#allocation4 + $0x3c0] ss:$16 sps:$4 sm:$0xff]   ;;  %v3829_v50 = vld [vmem:[#allocation4 + $0x3c8] ss:$16 sps:$4 sm:$0xff]   ;;  %v363_v38 = vadd.f32 %v4112_v25, %v108_v46 }
 0x190   :  { %2206 = vmatprep.mubr.bf16.mxu0 %v384_v28  ;;  %2288 = vmatprep.mubr.bf16.mxu1 %v384_v28  ;;  %v3834_v28 = vld [vmem:[#allocation4 + $0x3e4] ss:$16 sps:$4 sm:$0xff]  }
 0x191   :  { %v3840_v25 = vld [vmem:[%s4353_s7] sm:$0xff]  }
 0x192   :  { %2177 = vmatpush1.bf16.msra.mxu0 %v3748_v52  ;;  %2259 = vmatpush1.bf16.msra.mxu1 %v3751_v53  ;;  %v3837_v52 = vld [vmem:[#allocation4 + $0x3ec] ss:$16 sps:$4 sm:$0xff]   ;;  %v3832_v53 = vld [vmem:[#allocation4 + $0x3e0] ss:$16 sps:$4 sm:$0xff]  }
 0x193   :  { %2178 = vmatprep.subr.bf16.mxu0 %v3756_v54  ;;  %2260 = vmatprep.subr.bf16.mxu1 %v3759_v55  ;;  %v3835_v54 = vld [vmem:[#allocation4 + $0x3e8] ss:$16 sps:$4 sm:$0xff]   ;;  %v375_v55 = vmax.f32 %v363_v38, 0.0 }
 0x196   :  { %2179 = vmatpush1.bf16.msra.mxu0 %v3754_v56  ;;  %2261 = vmatpush1.bf16.msra.mxu1 %v3757_v57  ;;  %v3839_v56 = vld [vmem:[%s4353_s7 + $0xc0] sm:$0xff]  }
 0x197   :  { %2180 = vmatprep.subr.bf16.mxu0 %v3762_v58  ;;  %2262 = vmatprep.subr.bf16.mxu1 %v3765_v59  ;;  %v3841_v57 = vld [vmem:[%s4353_s7 + $0x80] sm:$0xff]   ;;  %v383_v58 = vpack.c.bf16 %v375_v55, %v375_v55  ;;  %v3842_v59 = vld [vmem:[%s4353_s7 + $0x48] sm:$0xff]  }
 0x198   :  { %v3873_v55 = vld [vmem:[%s4353_s7 + $0x180] sm:$0xff]  }
 0x19a   :  { %2181 = vmatpush1.bf16.msra.mxu0 %v3760_v60  ;;  %2263 = vmatpush1.bf16.msra.mxu1 %v3763_v62  ;;  %v3843_v60 = vld [vmem:[%s4353_s7 + $0xc8] sm:$0xff]  }
 0x19b   :  { %2182 = vmatprep.subr.bf16.mxu0 %v3768_v63  ;;  %2264 = vmatprep.subr.bf16.mxu1 %v3771_v0  ;;  %v3844_v62 = vld [vmem:[%s4353_s7 + $0x8] sm:$0xff]   ;;  %v3846_v0 = vld [vmem:[%s4353_s7 + $0x50] sm:$0xff]  }
 0x19c   :  { %v3845_v63 = vld [vmem:[%s4353_s7 + $0x88] sm:$0xff]  }
 0x19e   :  { %2183 = vmatpush1.bf16.msra.mxu0 %v3766_v1  ;;  %2265 = vmatpush1.bf16.msra.mxu1 %v3769_v2  ;;  %v3847_v1 = vld [vmem:[%s4353_s7 + $0xd0] sm:$0xff]  }
 0x19f   :  { %2184 = vmatprep.subr.bf16.mxu0 %v3774_v5  ;;  %2266 = vmatprep.subr.bf16.mxu1 %v3777_v6  ;;  %v3848_v2 = vld [vmem:[%s4353_s7 + $0x10] sm:$0xff]   ;;  %v3850_v6 = vld [vmem:[%s4353_s7 + $0x58] sm:$0xff]  }
 0x1a0   :  { %v3849_v5 = vld [vmem:[%s4353_s7 + $0x90] sm:$0xff]  }
 0x1a2   :  { %2185 = vmatpush1.bf16.msra.mxu0 %v3772_v7  ;;  %2267 = vmatpush1.bf16.msra.mxu1 %v3775_v8  ;;  %v3851_v7 = vld [vmem:[%s4353_s7 + $0xd8] sm:$0xff]  }
 0x1a3   :  { %2186 = vmatprep.subr.bf16.mxu0 %v3780_v9  ;;  %2268 = vmatprep.subr.bf16.mxu1 %v3783_v10  ;;  %v3852_v8 = vld [vmem:[%s4353_s7 + $0x18] sm:$0xff]   ;;  %v3854_v10 = vld [vmem:[%s4353_s7 + $0x60] sm:$0xff]  }
 0x1a4   :  { %v3853_v9 = vld [vmem:[%s4353_s7 + $0x98] sm:$0xff]  }
 0x1a6   :  { %2187 = vmatpush1.bf16.msra.mxu0 %v3778_v11  ;;  %2269 = vmatpush1.bf16.msra.mxu1 %v3781_v12  ;;  %v3855_v11 = vld [vmem:[%s4353_s7 + $0xe0] sm:$0xff]  }
 0x1a7   :  { %2188 = vmatprep.subr.bf16.mxu0 %v3786_v13  ;;  %2270 = vmatprep.subr.bf16.mxu1 %v3789_v14  ;;  %v3856_v12 = vld [vmem:[%s4353_s7 + $0x20] sm:$0xff]   ;;  %v3858_v14 = vld [vmem:[%s4353_s7 + $0x68] sm:$0xff]  }
 0x1a8   :  { %v3857_v13 = vld [vmem:[%s4353_s7 + $0xa0] sm:$0xff]  }
 0x1aa   :  { %2189 = vmatpush1.bf16.msra.mxu0 %v3784_v15  ;;  %2271 = vmatpush1.bf16.msra.mxu1 %v3787_v16  ;;  %v3859_v15 = vld [vmem:[%s4353_s7 + $0xe8] sm:$0xff]  }
 0x1ab   :  { %2190 = vmatprep.subr.bf16.mxu0 %v3792_v17  ;;  %2272 = vmatprep.subr.bf16.mxu1 %v3795_v18  ;;  %v3860_v16 = vld [vmem:[%s4353_s7 + $0x28] sm:$0xff]   ;;  %v3862_v18 = vld [vmem:[%s4353_s7 + $0x70] sm:$0xff]  }
 0x1ac   :  { %v3861_v17 = vld [vmem:[%s4353_s7 + $0xa8] sm:$0xff]  }
 0x1ae   :  { %2191 = vmatpush1.bf16.msra.mxu0 %v3790_v19  ;;  %2273 = vmatpush1.bf16.msra.mxu1 %v3793_v20  ;;  %v3863_v19 = vld [vmem:[%s4353_s7 + $0xf0] sm:$0xff]  }
 0x1af   :  { %2192 = vmatprep.subr.bf16.mxu0 %v3798_v21  ;;  %2274 = vmatprep.subr.bf16.mxu1 %v3801_v51  ;;  %v3864_v20 = vld [vmem:[%s4353_s7 + $0x30] sm:$0xff]   ;;  %v3866_v51 = vld [vmem:[%s4353_s7 + $0x78] sm:$0xff]  }
 0x1b0   :  { %v3865_v21 = vld [vmem:[%s4353_s7 + $0xb0] sm:$0xff]  }
 0x1b2   :  { %2193 = vmatpush1.bf16.msra.mxu0 %v3796_v22  ;;  %2275 = vmatpush1.bf16.msra.mxu1 %v3799_v23  ;;  %v3867_v22 = vld [vmem:[%s4353_s7 + $0xf8] sm:$0xff]  }
 0x1b3   :  { %2194 = vmatprep.subr.bf16.mxu0 %v3804_v24  ;;  %2276 = vmatprep.subr.bf16.mxu1 %v3807_v26  ;;  %v3868_v23 = vld [vmem:[%s4353_s7 + $0x38] sm:$0xff]   ;;  %v3870_v26 = vld [vmem:[%s4353_s7 + $0x140] sm:$0xff]  }
 0x1b4   :  { %v3869_v24 = vld [vmem:[%s4353_s7 + $0xb8] sm:$0xff]  }
 0x1b6   :  { %2195 = vmatpush1.bf16.msra.mxu0 %v3802_v27  ;;  %2277 = vmatpush1.bf16.msra.mxu1 %v3805_v4  ;;  %v3871_v27 = vld [vmem:[%s4353_s7 + $0x1c0] sm:$0xff]  }
 0x1b7   :  { %2196 = vmatprep.subr.bf16.mxu0 %v3810_v29  ;;  %2278 = vmatprep.subr.bf16.mxu1 %v3813_v30  ;;  %v513_v4 = vld [vmem:[%s4350_s4] sm:$0xf] }
 0x1b8   :  { %v518_v29 = vrot.slane %v513_v4, %v4087_v39  ;;  %v526_v30 = vrot.slane %v513_v4, %v4117_v61 }
 0x1ba   :  { %2197 = vmatpush1.bf16.msra.mxu0 %v3808_v31  ;;  %2279 = vmatpush1.bf16.msra.mxu1 %v3811_v32  ;;  %v522_v31 = vrot.slane %v513_v4, %v4095_v41  ;;  %v530_v32 = vrot.slane %v513_v4, %v4098_v42 }
 0x1bb   :  { %2198 = vmatprep.subr.bf16.mxu0 %v3816_v33  ;;  %2280 = vmatprep.subr.bf16.mxu1 %v3819_v34 }
 0x1be   :  { %2199 = vmatpush1.bf16.msra.mxu0 %v3814_v35  ;;  %2281 = vmatpush1.bf16.msra.mxu1 %v3817_v36 }
 0x1bf   :  { %2200 = vmatprep.subr.bf16.mxu0 %v3822_v43  ;;  %2282 = vmatprep.subr.bf16.mxu1 %v3825_v44 }
 0x1c2   :  { %2201 = vmatpush1.bf16.msra.mxu0 %v3820_v45  ;;  %2283 = vmatpush1.bf16.msra.mxu1 %v3823_v3 }
 0x1c3   :  { %2202 = vmatprep.subr.bf16.mxu0 %v3828_v47  ;;  %2284 = vmatprep.subr.bf16.mxu1 %v3831_v48 }
 0x1c6   :  { %2203 = vmatpush1.bf16.msra.mxu0 %v3826_v49  ;;  %2285 = vmatpush1.bf16.msra.mxu1 %v3829_v50 }
 0x1c7   :  { %2204 = vmatprep.subr.bf16.mxu0 %v3834_v28  ;;  %2286 = vmatprep.subr.bf16.mxu1 %v3837_v52 }
 0x1ca   :  { %2205 = vmatpush1.bf16.msra.mxu0 %v3832_v53  ;;  %2287 = vmatpush1.bf16.msra.mxu1 %v3835_v54  ;;  %v3872_v54 = vld [vmem:[%s4353_s7 + $0x100] sm:$0xff]  }
 0x1cb   :  { %3337 = vmatprep.subr.bf16.mxu0 %v3838_v40  ;;  %3359 = vmatprep.subr.bf16.mxu1 %v3839_v56 }
 0x1cd   :  { %2207 = vmatmul.mubr.bf16.vlgmr.msra.gmra.mrb[12].mxu0 %v383_v58  ;;  %2289 = vmatmul.mubr.bf16.vlgmr.msra.gmra.mrb[12].mxu1 %v383_v58  ;;  %v3876_v58 = vld [vmem:[%s4353_s7 + $0x108] sm:$0xff]  }
 0x1ce   :  { %3338 = vmatpush3.bf16.msra.mxu0 %v3840_v25  ;;  %3360 = vmatpush3.bf16.msra.mxu1 %v3841_v57  ;;  %v3874_v25 = vld [vmem:[%s4353_s7 + $0x148] sm:$0xff]  }
 0x1cf   :  { %3339 = vmatprep.subr.bf16.mxu0 %v3842_v59  ;;  %3361 = vmatprep.subr.bf16.mxu1 %v3843_v60  ;;  %v3875_v57 = vld [vmem:[%s4353_s7 + $0x1c8] sm:$0xff]   ;;  %v3878_v60 = vld [vmem:[%s4353_s7 + $0x150] sm:$0xff]  }
 0x1d0   :  { %v3877_v59 = vld [vmem:[%s4353_s7 + $0x188] sm:$0xff]  }
 0x1d2   :  { %3340 = vmatpush3.bf16.msra.mxu0 %v3844_v62  ;;  %3362 = vmatpush3.bf16.msra.mxu1 %v3845_v63  ;;  %v3879_v62 = vld [vmem:[%s4353_s7 + $0x1d0] sm:$0xff]  }
 0x1d3   :  { %3341 = vmatprep.subr.bf16.mxu0 %v3846_v0  ;;  %3363 = vmatprep.subr.bf16.mxu1 %v3847_v1  ;;  %v3880_v63 = vld [vmem:[%s4353_s7 + $0x110] sm:$0xff]   ;;  %v3882_v1 = vld [vmem:[%s4353_s7 + $0x158] sm:$0xff]  }
 0x1d4   :  { %v3881_v0 = vld [vmem:[%s4353_s7 + $0x190] sm:$0xff]  }
 0x1d6   :  { %3342 = vmatpush3.bf16.msra.mxu0 %v3848_v2  ;;  %3364 = vmatpush3.bf16.msra.mxu1 %v3849_v5  ;;  %v3883_v2 = vld [vmem:[%s4353_s7 + $0x1d8] sm:$0xff]  }
 0x1d7   :  { %3343 = vmatprep.subr.bf16.mxu0 %v3850_v6  ;;  %3365 = vmatprep.subr.bf16.mxu1 %v3851_v7  ;;  %v3884_v5 = vld [vmem:[%s4353_s7 + $0x118] sm:$0xff]   ;;  %v3886_v7 = vld [vmem:[%s4353_s7 + $0x160] sm:$0xff]  }
 0x1d8   :  { %v3885_v6 = vld [vmem:[%s4353_s7 + $0x198] sm:$0xff]  }
 0x1da   :  { %3344 = vmatpush3.bf16.msra.mxu0 %v3852_v8  ;;  %3366 = vmatpush3.bf16.msra.mxu1 %v3853_v9  ;;  %v3887_v8 = vld [vmem:[%s4353_s7 + $0x1e0] sm:$0xff]  }
 0x1db   :  { %3345 = vmatprep.subr.bf16.mxu0 %v3854_v10  ;;  %3367 = vmatprep.subr.bf16.mxu1 %v3855_v11  ;;  %v3888_v9 = vld [vmem:[%s4353_s7 + $0x120] sm:$0xff]   ;;  %v3890_v11 = vld [vmem:[%s4353_s7 + $0x168] sm:$0xff]  }
 0x1dc   :  { %v3889_v10 = vld [vmem:[%s4353_s7 + $0x1a0] sm:$0xff]  }
 0x1de   :  { %3346 = vmatpush3.bf16.msra.mxu0 %v3856_v12  ;;  %3368 = vmatpush3.bf16.msra.mxu1 %v3857_v13  ;;  %v3891_v12 = vld [vmem:[%s4353_s7 + $0x1e8] sm:$0xff]  }
 0x1df   :  { %3347 = vmatprep.subr.bf16.mxu0 %v3858_v14  ;;  %3369 = vmatprep.subr.bf16.mxu1 %v3859_v15  ;;  %v3892_v13 = vld [vmem:[%s4353_s7 + $0x128] sm:$0xff]   ;;  %v3894_v15 = vld [vmem:[%s4353_s7 + $0x170] sm:$0xff]  }
 0x1e0   :  { %v3893_v14 = vld [vmem:[%s4353_s7 + $0x1a8] sm:$0xff]  }
 0x1e2   :  { %3348 = vmatpush3.bf16.msra.mxu0 %v3860_v16  ;;  %3370 = vmatpush3.bf16.msra.mxu1 %v3861_v17  ;;  %v3895_v16 = vld [vmem:[%s4353_s7 + $0x1f0] sm:$0xff]  }
 0x1e3   :  { %3349 = vmatprep.subr.bf16.mxu0 %v3862_v18  ;;  %3371 = vmatprep.subr.bf16.mxu1 %v3863_v19  ;;  %v3896_v17 = vld [vmem:[%s4353_s7 + $0x130] sm:$0xff]   ;;  %v3898_v19 = vld [vmem:[%s4353_s7 + $0x178] sm:$0xff]  }
 0x1e4   :  { %v3897_v18 = vld [vmem:[%s4353_s7 + $0x1b0] sm:$0xff]  }
 0x1e6   :  { %3350 = vmatpush3.bf16.msra.mxu0 %v3864_v20  ;;  %3372 = vmatpush3.bf16.msra.mxu1 %v3865_v21  ;;  %v3899_v20 = vld [vmem:[%s4353_s7 + $0x1f8] sm:$0xff]  }
 0x1e7   :  { %3351 = vmatprep.subr.bf16.mxu0 %v3866_v51  ;;  %3373 = vmatprep.subr.bf16.mxu1 %v3867_v22  ;;  %v3900_v21 = vld [vmem:[%s4353_s7 + $0x138] sm:$0xff]   ;;  %v1471_v22 = vld [vmem:[%s4352_s6] sm:$0xf] }
 0x1e8   :  { %v3901_v51 = vld [vmem:[%s4353_s7 + $0x1b8] sm:$0xff]  }
 0x1ea   :  { %3352 = vmatpush3.bf16.msra.mxu0 %v3868_v23  ;;  %3374 = vmatpush3.bf16.msra.mxu1 %v3869_v24  ;;  %v1476_v23 = vrot.slane %v1471_v22, %v4087_v39  ;;  %v1484_v24 = vrot.slane %v1471_v22, %v4117_v61 }
 0x1eb   :  { %3381 = vmatprep.subr.bf16.mxu0 %v3870_v26  ;;  %3403 = vmatprep.subr.bf16.mxu1 %v3871_v27  ;;  %v1480_v26 = vrot.slane %v1471_v22, %v4095_v41  ;;  %v1488_v27 = vrot.slane %v1471_v22, %v4098_v42 }
 0x220   :  { %v1250_v33 = vpop.f32.mrb[8].mxu0  ;;  %v1332_v34 = vpop.f32.mrb[8].mxu1 }
 0x221   :  { %v3425_v35 = vadd.f32 %v1250_v33, %v518_v29  ;;  %v3427_v36 = vadd.f32 %v1332_v34, %v526_v30  ;;  %v1252_v37 = vpop.f32.mrb[9].mxu0  ;;  %v1334_v43 = vpop.f32.mrb[9].mxu1 }
 0x222   :  { %v3426_v44 = vadd.f32 %v1252_v37, %v522_v31  ;;  %v3428_v45 = vadd.f32 %v1334_v43, %v530_v32  ;;  %v1254_v3 = vpop.f32.mrb[10].mxu0  ;;  %v1336_v46 = vpop.f32.mrb[10].mxu1 }
 0x223   :  { %v1339_v47 = vmax.f32 %v3425_v35, 0.0  ;;  %v1341_v48 = vmax.f32 %v3427_v36, 0.0  ;;  %v1255_v49 = vpop.f32.mrb[11].mxu0  ;;  %v1337_v50 = vpop.f32.mrb[11].mxu1 }
 0x224   :  { %v1340_v38 = vmax.f32 %v3426_v44, 0.0  ;;  %v1342_v28 = vmax.f32 %v3428_v45, 0.0  ;;  %v3272_v50 = vld [vmem:[%s4354_s8] ss:$0 sm:$0xff] }
 0x225   :  { %v2301_v40 = vpack.c.bf16 %v1339_v47, %v1339_v47  ;;  %v2303_v56 = vpack.c.bf16 %v1341_v48, %v1341_v48 }
 0x226   :  { %v2302_v52 = vpack.c.bf16 %v1340_v38, %v1340_v38  ;;  %v2304_v53 = vpack.c.bf16 %v1342_v28, %v1342_v28 }
 0x228   :  { %2860 = vmatprep.mubr.bf16.mxu0 %v2302_v52  ;;  %2900 = vmatprep.mubr.bf16.mxu1 %v2304_v53 }
 0x229   :  { %2861 = vmatmul.mubr.bf16.vlgmr.msra.gmra.mrb[16].mxu0 %v2301_v40  ;;  %2901 = vmatmul.mubr.bf16.vlgmr.msra.gmra.mrb[16].mxu1 %v2303_v56 }
 0x22a   :  { %3382 = vmatpush3.bf16.msra.mxu0 %v3872_v54  ;;  %3404 = vmatpush3.bf16.msra.mxu1 %v3873_v55 }
 0x22b   :  { %3383 = vmatprep.subr.bf16.mxu0 %v3874_v25  ;;  %3405 = vmatprep.subr.bf16.mxu1 %v3875_v57 }
 0x22e   :  { %3384 = vmatpush3.bf16.msra.mxu0 %v3876_v58  ;;  %3406 = vmatpush3.bf16.msra.mxu1 %v3877_v59 }
 0x22f   :  { %3385 = vmatprep.subr.bf16.mxu0 %v3878_v60  ;;  %3407 = vmatprep.subr.bf16.mxu1 %v3879_v62 }
 0x232   :  { %3386 = vmatpush3.bf16.msra.mxu0 %v3880_v63  ;;  %3408 = vmatpush3.bf16.msra.mxu1 %v3881_v0 }
 0x233   :  { %3387 = vmatprep.subr.bf16.mxu0 %v3882_v1  ;;  %3409 = vmatprep.subr.bf16.mxu1 %v3883_v2 }
 0x236   :  { %3388 = vmatpush3.bf16.msra.mxu0 %v3884_v5  ;;  %3410 = vmatpush3.bf16.msra.mxu1 %v3885_v6 }
 0x237   :  { %3389 = vmatprep.subr.bf16.mxu0 %v3886_v7  ;;  %3411 = vmatprep.subr.bf16.mxu1 %v3887_v8 }
 0x23a   :  { %3390 = vmatpush3.bf16.msra.mxu0 %v3888_v9  ;;  %3412 = vmatpush3.bf16.msra.mxu1 %v3889_v10 }
 0x23b   :  { %3391 = vmatprep.subr.bf16.mxu0 %v3890_v11  ;;  %3413 = vmatprep.subr.bf16.mxu1 %v3891_v12 }
 0x23e   :  { %3392 = vmatpush3.bf16.msra.mxu0 %v3892_v13  ;;  %3414 = vmatpush3.bf16.msra.mxu1 %v3893_v14 }
 0x23f   :  { %3393 = vmatprep.subr.bf16.mxu0 %v3894_v15  ;;  %3415 = vmatprep.subr.bf16.mxu1 %v3895_v16 }
 0x242   :  { %3394 = vmatpush3.bf16.msra.mxu0 %v3896_v17  ;;  %3416 = vmatpush3.bf16.msra.mxu1 %v3897_v18 }
 0x243   :  { %3395 = vmatprep.subr.bf16.mxu0 %v3898_v19  ;;  %3417 = vmatprep.subr.bf16.mxu1 %v3899_v20 }
 0x246   :  { %3396 = vmatpush3.bf16.msra.mxu0 %v3900_v21  ;;  %3418 = vmatpush3.bf16.msra.mxu1 %v3901_v51 }
 0x2a0   :  { %v2208_v4 = vpop.f32.mrb[12].mxu0  ;;  %v2290_v29 = vpop.f32.mrb[12].mxu1 }
 0x2a1   :  { %v3429_v30 = vadd.f32 %v2208_v4, %v1476_v23  ;;  %v3431_v31 = vadd.f32 %v2290_v29, %v1484_v24  ;;  %v2210_v32 = vpop.f32.mrb[13].mxu0  ;;  %v2292_v33 = vpop.f32.mrb[13].mxu1 }
 0x2a2   :  { %v3430_v34 = vadd.f32 %v2210_v32, %v1480_v26  ;;  %v3432_v35 = vadd.f32 %v2292_v33, %v1488_v27  ;;  %v2212_v36 = vpop.f32.mrb[14].mxu0  ;;  %v2294_v37 = vpop.f32.mrb[14].mxu1 }
 0x2a3   :  { %v2297_v43 = vmax.f32 %v3429_v30, 0.0  ;;  %v2299_v44 = vmax.f32 %v3431_v31, 0.0  ;;  %v2213_v45 = vpop.f32.mrb[15].mxu0  ;;  %v2295_v39 = vpop.f32.mrb[15].mxu1 }
 0x2a4   :  { %v2298_v3 = vmax.f32 %v3430_v34, 0.0  ;;  %v2300_v61 = vmax.f32 %v3432_v35, 0.0 }
 0x2a5   :  { %v2305_v47 = vpack.c.bf16 %v2297_v43, %v2297_v43  ;;  %v2307_v42 = vpack.c.bf16 %v2299_v44, %v2299_v44 }
 0x2a6   :  { %v2306_v46 = vpack.c.bf16 %v2298_v3, %v2298_v3  ;;  %v2308_v41 = vpack.c.bf16 %v2300_v61, %v2300_v61 }
 0x2a8   :  { %2940 = vmatprep.mubr.bf16.mxu0 %v2306_v46  ;;  %2980 = vmatprep.mubr.bf16.mxu1 %v2308_v41 }
 0x2a9   :  { %2941 = vmatmul.mubr.bf16.vlgmr.msra.gmra.mrb[20].mxu0 %v2305_v47  ;;  %2981 = vmatmul.mubr.bf16.vlgmr.msra.gmra.mrb[20].mxu1 %v2307_v42 }
 0x2fc   :  { %v3353_v48 = vpop.f32.mrb[16].mxu0  ;;  %v3375_v49 = vpop.f32.mrb[16].mxu1 }
 0x2fd   :  { %v3354_v38 = vpop.f32.mrb[17].mxu0  ;;  %v3376_v28 = vpop.f32.mrb[17].mxu1 }
 0x2fe   :  { %v3355_v52 = vadd.f32 %v3354_v38, %v3353_v48  ;;  %v3377_v53 = vadd.f32 %v3376_v28, %v3375_v49  ;;  %v3356_v54 = vpop.f32.mrb[18].mxu0  ;;  %v3378_v55 = vpop.f32.mrb[18].mxu1 }
 0x2ff   :  { %v3357_v40 = vpop.f32.mrb[19].mxu0  ;;  %v3379_v56 = vpop.f32.mrb[19].mxu1 }
 0x300   :  { %v2863_v25 = vadd.f32 %v3355_v52, %v3272_v50 }
 0x302   :  { %v2903_v57 = vadd.f32 %v3377_v53, %v2863_v25 }
 0x37c   :  { %v3397_v58 = vpop.f32.mrb[20].mxu0  ;;  %v3419_v59 = vpop.f32.mrb[20].mxu1 }
 0x37d   :  { %v3398_v60 = vpop.f32.mrb[21].mxu0  ;;  %v3420_v62 = vpop.f32.mrb[21].mxu1 }
 0x37e   :  { %v3399_v63 = vadd.f32 %v3398_v60, %v3397_v58  ;;  %v3421_v0 = vadd.f32 %v3420_v62, %v3419_v59  ;;  %v3400_v1 = vpop.f32.mrb[22].mxu0  ;;  %v3422_v2 = vpop.f32.mrb[22].mxu1 }
 0x37f   :  { %v3401_v5 = vpop.f32.mrb[23].mxu0  ;;  %v3423_v6 = vpop.f32.mrb[23].mxu1 }
 0x380   :  { %v2943_v7 = vadd.f32 %v3399_v63, %v2903_v57 }
 0x382   :  { %v2983_v8 = vadd.f32 %v3421_v0, %v2943_v7 }
 0x384   :  { %2989 = vst.msk [vmem:[%s4355_s9] sm:$0xff] %vm2988_vm1, %v2983_v8 }
 0x385   :  { %2994 = vsyncpa [#allocation3], 1 }
 0x386   :  { %2995 = vsyncpa [#allocation5], 1 }

</bundles_post_ra>
